<compile_context>
chip_gen: v7x
topology: tpu7x:2x2x1
jax: 0.10.0
libtpu: 0.0.40
codegen_flags: <defaults>
</compile_context>

<pallas_src>
import functools
import math

import jax
import jax.numpy as jnp
from jax.experimental import pallas as pl
from jax.experimental.pallas import tpu as pltpu


def _mhsa_kernel(x_ref, wqkv_ref, bqkv_ref, wo_ref, bo_ref, o_ref, *,
                 d_k: int, heads_per_step: int, batch_per_step: int,
                 seq_len: int):
    """Grid = (batch_block, head_group).  One (Bt batches, hp heads) per step.

    x_ref    : (Bt, S, D)             bf16  (constant across the head axis)
    wqkv_ref : (1, D, hp*3*d_k)       bf16  (per-group fused Q/K/V, Q pre-scaled)
    bqkv_ref : (1, 1, hp*3*d_k)       f32
    wo_ref   : (1, hp*d_k, D)         bf16  (per-group rows of W_o)
    bo_ref   : (1, D)                 f32
    o_ref    : (Bt, S, D)             f32   (resident across the head axis)
    """
    h = pl.program_id(1)

    @pl.when(h == 0)
    def _init():
        # Initialise the resident output block with the broadcast output bias,
        # so the last head step needs no separate finalize pass.
        o_ref[...] = jnp.broadcast_to(bo_ref[...], o_ref.shape).astype(o_ref.dtype)

    n = batch_per_step * seq_len
    x = x_ref[...].reshape(n, -1)                                   # (Bt*S, D) bf16

    # Fused Q/K/V projection for all heads of this step: one MXU matmul with
    # N = hp*3*d_k, f32 accumulation.  Q columns are pre-scaled by 1/sqrt(d_k).
    qkv = jnp.dot(x, wqkv_ref[0],
                  preferred_element_type=jnp.float32) + bqkv_ref[0]  # (Bt*S, hp*3*d_k)

    o_parts = []
    for hi in range(heads_per_step):
        base = hi * 3 * d_k
        q = qkv[:, base + 0 * d_k:base + 1 * d_k].astype(jnp.bfloat16)
        k = qkv[:, base + 1 * d_k:base + 2 * d_k].astype(jnp.bfloat16)
        v = qkv[:, base + 2 * d_k:base + 3 * d_k].astype(jnp.bfloat16)

        outs = []
        for bi in range(batch_per_step):
            lo = bi * seq_len
            qb = q[lo:lo + seq_len]
            kb = k[lo:lo + seq_len]
            vb = v[lo:lo + seq_len]
            # Scores = q @ k^T via dot_general contracting lane dims
            # (no materialized transpose).
            s = jax.lax.dot_general(qb, kb, (((1,), (1,)), ((), ())),
                                    preferred_element_type=jnp.float32)  # (S, S)
            s = s - jnp.max(s, axis=-1, keepdims=True)
            p = jnp.exp(s)
            p = p * pl.reciprocal(jnp.sum(p, axis=-1, keepdims=True), approx=True)
            outs.append(jnp.dot(p.astype(jnp.bfloat16), vb,
                                preferred_element_type=jnp.float32))     # (S, d_k)
        o_parts.append(outs[0] if batch_per_step == 1
                       else jnp.concatenate(outs, axis=0))               # (Bt*S, d_k)

    o_cat = (o_parts[0] if heads_per_step == 1
             else jnp.concatenate(o_parts, axis=-1))                     # (Bt*S, hp*d_k)

    # Fold the step's heads into the output projection: a single K = hp*d_k
    # contraction, accumulated straight into the resident f32 output block.
    upd = jnp.dot(o_cat.astype(jnp.bfloat16), wo_ref[0],
                  preferred_element_type=jnp.float32)                    # (Bt*S, D)
    o_ref[...] += upd.reshape(o_ref.shape)


def multi_head_self_attention(x, params, *, num_heads: int,
                              batch_block: int | None = None,
                              heads_per_step: int | None = None):
    """x: (B, S, D) float32.  params: dict of wq,bq,wk,bk,wv,bv,wo,bo (f32)."""
    B, S, D = x.shape
    assert D % num_heads == 0
    d_k = D // num_heads
    H = num_heads
    scale = 1.0 / math.sqrt(d_k)
    bf16, f32 = jnp.bfloat16, jnp.float32

    if heads_per_step is None:
        heads_per_step = 2 if num_heads % 2 == 0 else 1
    hp = heads_per_step
    assert num_heads % hp == 0

    if batch_block is None:
        # Largest divisor of B whose double-buffered x/out blocks stay under a
        # ~12 MiB budget (leaves room for weights + temporaries in VMEM).
        budget = 12 * 1024 * 1024
        batch_block = 1
        for cand in range(B, 0, -1):
            if B % cand == 0 and 2 * cand * S * D * (2 + 4) <= budget:
                batch_block = cand
                break
    Bt = batch_block
    assert B % Bt == 0

    # ---- wrapper-side parameter packing (pure layout plumbing, runs in XLA) ----
    def per_head_w(w):            # (D, D) -> (H, D, d_k)   output-column split
        return w.reshape(D, H, d_k).transpose(1, 0, 2)

    def per_head_b(b):            # (1, D) -> (H, d_k)
        return b.reshape(H, d_k)

    # Fused per-head QKV weight/bias, with the 1/sqrt(d_k) scale folded into Q.
    wqkv_h = jnp.concatenate(
        [per_head_w(params["wq"] * scale),
         per_head_w(params["wk"]),
         per_head_w(params["wv"])], axis=-1)                      # (H, D, 3*d_k)
    bqkv_h = jnp.concatenate(
        [per_head_b(params["bq"] * scale),
         per_head_b(params["bk"]),
         per_head_b(params["bv"])], axis=-1)                      # (H, 3*d_k)

    # Group hp heads per grid step (layout: [head0: q,k,v | head1: q,k,v | ...]).
    wqkv = (wqkv_h.reshape(H // hp, hp, D, 3 * d_k)
            .transpose(0, 2, 1, 3)
            .reshape(H // hp, D, hp * 3 * d_k).astype(bf16))      # (H/hp, D, hp*3*d_k)
    bqkv = bqkv_h.reshape(H // hp, 1, hp * 3 * d_k).astype(f32)   # (H/hp, 1, hp*3*d_k)
    wo = params["wo"].reshape(H // hp, hp * d_k, D).astype(bf16)  # (H/hp, hp*d_k, D)
    bo = params["bo"].astype(f32)                                 # (1, D)

    x_bf = x.astype(bf16)

    kernel = functools.partial(_mhsa_kernel, d_k=d_k, heads_per_step=hp,
                               batch_per_step=Bt, seq_len=S)

    # Advisory cost estimate (lets XLA schedule the weight repack around us).
    flops = 8 * B * S * D * D + 4 * B * S * S * D
    transcendentals = B * H * S * S
    bytes_accessed = (B * S * D * 2                  # x read (bf16)
                      + B * S * D * 4                # out write (f32)
                      + (B // Bt) * 4 * D * D * 2)   # weights re-streamed per batch block

    # Resident VMEM estimate: double-buffered blocks + f32 temporaries.
    vmem_need = (2 * Bt * S * D * 2                              # x blocks (bf16)
                 + 2 * Bt * S * D * 4                            # out blocks (f32)
                 + 2 * (3 * D * hp * d_k + hp * d_k * D) * 2     # weight blocks (bf16)
                 + Bt * S * hp * 3 * d_k * 4                     # qkv temp (f32)
                 + 4 * S * S * 4                                 # score/prob temps (f32)
                 + 2 * Bt * S * D * 4)                           # o_cat / W_o update temps
    vmem_limit = int(min(max(2 * vmem_need, 32 * 1024 * 1024),
                         64 * 1024 * 1024))                      # cap: v7x physical VMEM

    return pl.pallas_call(
        kernel,
        out_shape=jax.ShapeDtypeStruct((B, S, D), x.dtype),
        grid_spec=pltpu.PrefetchScalarGridSpec(
            num_scalar_prefetch=0,
            grid=(B // Bt, H // hp),                              # head axis innermost
            in_specs=[
                pl.BlockSpec((Bt, S, D), lambda b, h: (b, 0, 0)),            # x (const over h)
                pl.BlockSpec((1, D, hp * 3 * d_k), lambda b, h: (h, 0, 0)),  # fused qkv weight
                pl.BlockSpec((1, 1, hp * 3 * d_k), lambda b, h: (h, 0, 0)),  # fused qkv bias
                pl.BlockSpec((1, hp * d_k, D), lambda b, h: (h, 0, 0)),      # grouped W_o rows
                pl.BlockSpec((1, D), lambda b, h: (0, 0)),                   # b_o
            ],
            out_specs=pl.BlockSpec((Bt, S, D), lambda b, h: (b, 0, 0)),
        ),
        compiler_params=pltpu.CompilerParams(
            dimension_semantics=("parallel", "arbitrary"),
            vmem_limit_bytes=vmem_limit),
        cost_estimate=pl.CostEstimate(flops=flops,
                                      transcendentals=transcendentals,
                                      bytes_accessed=bytes_accessed),
    )(x_bf, wqkv, bqkv, wo, bo)


def _reference(x, params, num_heads):
    """Pure-JAX f32 reference replicating the PyTorch forward (eval mode, no mask)."""
    B, S, D = x.shape
    d_k = D // num_heads
    q = x @ params["wq"] + params["bq"]
    k = x @ params["wk"] + params["bk"]
    v = x @ params["wv"] + params["bv"]

    def split(t):  # (B,S,D) -> (B,H,S,d_k)
        return t.reshape(B, S, num_heads, d_k).transpose(0, 2, 1, 3)

    qh, kh, vh = split(q), split(k), split(v)
    s = jnp.einsum("bhqd,bhkd->bhqk", qh, kh) / math.sqrt(d_k)
    p = jax.nn.softmax(s, axis=-1)
    o = jnp.einsum("bhqk,bhkd->bhqd", p, vh)
    o = o.transpose(0, 2, 1, 3).reshape(B, S, D)
    return o @ params["wo"] + params["bo"]


if __name__ == "__main__":
    # Small shapes consistent with the module: x is [B, S, d_model] with
    # d_k = d_model / num_heads = 128, matching the real module (2304 / 18),
    # so every block / slice is lane-dense.  batch_block=2 and heads_per_step=2
    # exercise both grid axes (multiple batch blocks, multi-step head
    # accumulation into the resident output block).
    B, S, D = 4, 16, 512
    NUM_HEADS = 4

    key = jax.random.PRNGKey(0)
    keys = jax.random.split(key, 9)

    x = jax.random.normal(keys[0], (B, S, D), dtype=jnp.float32)

    # Deterministic parameter init (Linear weights stored as (d_in, d_out)).
    w_scale = 1.0 / math.sqrt(D)
    params = {
        "wq": jax.random.normal(keys[1], (D, D), jnp.float32) * w_scale,
        "bq": jax.random.normal(keys[2], (1, D), jnp.float32) * 0.01,
        "wk": jax.random.normal(keys[3], (D, D), jnp.float32) * w_scale,
        "bk": jax.random.normal(keys[4], (1, D), jnp.float32) * 0.01,
        "wv": jax.random.normal(keys[5], (D, D), jnp.float32) * w_scale,
        "bv": jax.random.normal(keys[6], (1, D), jnp.float32) * 0.01,
        "wo": jax.random.normal(keys[7], (D, D), jnp.float32) * w_scale,
        "bo": jax.random.normal(keys[8], (1, D), jnp.float32) * 0.01,
    }

    out = multi_head_self_attention(x, params, num_heads=NUM_HEADS,
                                    batch_block=2, heads_per_step=2)
    out = jax.block_until_ready(out)

    ref = _reference(x, params, NUM_HEADS)
    assert out.shape == (B, S, D), out.shape

    # bf16 MXU math + approx reciprocal vs. the pure-f32 reference -> loose tol.
    max_err = float(jnp.max(jnp.abs(out - ref)))
    assert jnp.allclose(out, ref, atol=1e-1, rtol=1e-1), max_err

    print("KERNEL_OK")
</pallas_src>

<mosaic_0001>
module attributes {stable_mosaic.version = 11 : i64} {
  func.func @_mhsa_kernel(%arg0: i32, %arg1: i32, %arg2: memref<2x16x512xbf16, #tpu.memory_space<vmem>>, %arg3: memref<1x512x768xbf16, #tpu.memory_space<vmem>>, %arg4: memref<1x1x768xf32, #tpu.memory_space<vmem>>, %arg5: memref<1x256x512xbf16, #tpu.memory_space<vmem>>, %arg6: memref<1x512xf32, #tpu.memory_space<vmem>>, %arg7: memref<2x16x512xf32, #tpu.memory_space<vmem>>) attributes {dimension_semantics = [#tpu.dimension_semantics<parallel>, #tpu.dimension_semantics<arbitrary>], iteration_bounds = array<i64: 2, 2>, scalar_prefetch = 0 : i64, scratch_operands = 0 : i64, tpu.core_type = #tpu.core_type<tc>, window_params = [{transform_indices = @transform_0, window_bounds = array<i64: 2, 16, 512>}, {transform_indices = @transform_1, window_bounds = array<i64: 1, 512, 768>}, {transform_indices = @transform_2, window_bounds = array<i64: 1, 1, 768>}, {transform_indices = @transform_3, window_bounds = array<i64: 1, 256, 512>}, {pipeline_mode = #tpu.pipeline_mode<synchronous>, transform_indices = @transform_4, window_bounds = array<i64: 1, 512>}, {transform_indices = @transform_5, window_bounds = array<i64: 2, 16, 512>}]} {
    %c0_i32 = arith.constant 0 : i32
    %0 = arith.cmpi eq, %arg1, %c0_i32 : i32
    %1 = arith.extui %0 : i1 to i32
    %c0_i32_0 = arith.constant 0 : i32
    %2 = arith.cmpi ne, %1, %c0_i32_0 : i32
    scf.if %2 {
      %c0_35 = arith.constant 0 : index
      %c0_36 = arith.constant 0 : index
      %99 = vector.load %arg6[%c0_35, %c0_36] : memref<1x512xf32, #tpu.memory_space<vmem>>, vector<1x512xf32>
      %100 = vector.shape_cast %99 : vector<1x512xf32> to vector<1x1x512xf32>
      %101 = vector.broadcast %100 : vector<1x1x512xf32> to vector<2x16x512xf32>
      %c0_37 = arith.constant 0 : index
      %c0_38 = arith.constant 0 : index
      %c0_39 = arith.constant 0 : index
      %102 = vector.load %arg7[%c0_37, %c0_38, %c0_39] : memref<2x16x512xf32, #tpu.memory_space<vmem>>, vector<2x16x512xf32>
      tpu.vector_store %arg7[%c0_37, %c0_38, %c0_39], %101 {strides = array<i32>} : memref<2x16x512xf32, #tpu.memory_space<vmem>>, vector<2x16x512xf32>,
    } else {
    }
    %c0 = arith.constant 0 : index
    %c0_1 = arith.constant 0 : index
    %c0_2 = arith.constant 0 : index
    %3 = vector.load %arg2[%c0, %c0_1, %c0_2] : memref<2x16x512xbf16, #tpu.memory_space<vmem>>, vector<2x16x512xbf16>
    %4 = vector.shape_cast %3 : vector<2x16x512xbf16> to vector<32x512xbf16>
    %c0_3 = arith.constant 0 : index
    %c0_4 = arith.constant 0 : index
    %c0_5 = arith.constant 0 : index
    %5 = vector.load %arg3[%c0_3, %c0_4, %c0_5] : memref<1x512x768xbf16, #tpu.memory_space<vmem>>, vector<1x512x768xbf16>
    %6 = vector.shape_cast %5 : vector<1x512x768xbf16> to vector<512x768xbf16>
    %cst = arith.constant dense<0.000000e+00> : vector<32x768xf32>
    %7 = tpu.matmul %4, %6, %cst {dimension_numbers = #tpu.dot_dimension_numbers<[1], [0], [0], [1], [0, 0, 1, 1], [], []>} : vector<32x512xbf16>, vector<512x768xbf16>, vector<32x768xf32> -> vector<32x768xf32>
    %c0_6 = arith.constant 0 : index
    %c0_7 = arith.constant 0 : index
    %c0_8 = arith.constant 0 : index
    %8 = vector.load %arg4[%c0_6, %c0_7, %c0_8] : memref<1x1x768xf32, #tpu.memory_space<vmem>>, vector<1x1x768xf32>
    %9 = vector.shape_cast %8 : vector<1x1x768xf32> to vector<1x768xf32>
    %10 = vector.broadcast %9 : vector<1x768xf32> to vector<32x768xf32>
    %11 = arith.addf %7, %10 : vector<32x768xf32>
    %12 = vector.extract_strided_slice %11 {offsets = [0, 0], sizes = [32, 128], strides = [1, 1]} : vector<32x768xf32> to vector<32x128xf32>
    %13 = arith.truncf %12 : vector<32x128xf32> to vector<32x128xbf16>
    %14 = vector.extract_strided_slice %11 {offsets = [0, 128], sizes = [32, 128], strides = [1, 1]} : vector<32x768xf32> to vector<32x128xf32>
    %15 = arith.truncf %14 : vector<32x128xf32> to vector<32x128xbf16>
    %16 = vector.extract_strided_slice %11 {offsets = [0, 256], sizes = [32, 128], strides = [1, 1]} : vector<32x768xf32> to vector<32x128xf32>
    %17 = arith.truncf %16 : vector<32x128xf32> to vector<32x128xbf16>
    %18 = vector.extract_strided_slice %13 {offsets = [0, 0], sizes = [16, 128], strides = [1, 1]} : vector<32x128xbf16> to vector<16x128xbf16>
    %19 = vector.extract_strided_slice %15 {offsets = [0, 0], sizes = [16, 128], strides = [1, 1]} : vector<32x128xbf16> to vector<16x128xbf16>
    %20 = vector.extract_strided_slice %17 {offsets = [0, 0], sizes = [16, 128], strides = [1, 1]} : vector<32x128xbf16> to vector<16x128xbf16>
    %cst_9 = arith.constant dense<0.000000e+00> : vector<16x16xf32>
    %21 = tpu.matmul %18, %19, %cst_9 {dimension_numbers = #tpu.dot_dimension_numbers<[1], [1], [0], [0], [0, 0, 1, 0], [], []>} : vector<16x128xbf16>, vector<16x128xbf16>, vector<16x16xf32> -> vector<16x16xf32>
    %cst_10 = arith.constant dense<0xFF800000> : vector<16xf32>
    %22 = vector.multi_reduction <maximumf>, %21, %cst_10 [1] : vector<16x16xf32> to vector<16xf32>
    %23 = vector.shape_cast %22 : vector<16xf32> to vector<16x1xf32>
    %24 = vector.broadcast %23 : vector<16x1xf32> to vector<16x16xf32>
    %25 = arith.subf %21, %24 : vector<16x16xf32>
    %26 = math.exp %25 : vector<16x16xf32>
    %cst_11 = arith.constant dense<0.000000e+00> : vector<16xf32>
    %27 = vector.multi_reduction <add>, %26, %cst_11 [1] : vector<16x16xf32> to vector<16xf32>
    %28 = vector.shape_cast %27 : vector<16xf32> to vector<16x1xf32>
    %29 = tpu.reciprocal %28 {approx = true} : vector<16x1xf32> -> vector<16x1xf32>
    %30 = vector.broadcast %29 : vector<16x1xf32> to vector<16x16xf32>
    %31 = arith.mulf %26, %30 : vector<16x16xf32>
    %32 = arith.truncf %31 : vector<16x16xf32> to vector<16x16xbf16>
    %cst_12 = arith.constant dense<0.000000e+00> : vector<16x128xf32>
    %33 = tpu.matmul %32, %20, %cst_12 {dimension_numbers = #tpu.dot_dimension_numbers<[1], [0], [0], [1], [0, 0, 1, 1], [], []>} : vector<16x16xbf16>, vector<16x128xbf16>, vector<16x128xf32> -> vector<16x128xf32>
    %34 = vector.extract_strided_slice %13 {offsets = [16, 0], sizes = [16, 128], strides = [1, 1]} : vector<32x128xbf16> to vector<16x128xbf16>
    %35 = vector.extract_strided_slice %15 {offsets = [16, 0], sizes = [16, 128], strides = [1, 1]} : vector<32x128xbf16> to vector<16x128xbf16>
    %36 = vector.extract_strided_slice %17 {offsets = [16, 0], sizes = [16, 128], strides = [1, 1]} : vector<32x128xbf16> to vector<16x128xbf16>
    %cst_13 = arith.constant dense<0.000000e+00> : vector<16x16xf32>
    %37 = tpu.matmul %34, %35, %cst_13 {dimension_numbers = #tpu.dot_dimension_numbers<[1], [1], [0], [0], [0, 0, 1, 0], [], []>} : vector<16x128xbf16>, vector<16x128xbf16>, vector<16x16xf32> -> vector<16x16xf32>
    %cst_14 = arith.constant dense<0xFF800000> : vector<16xf32>
    %38 = vector.multi_reduction <maximumf>, %37, %cst_14 [1] : vector<16x16xf32> to vector<16xf32>
    %39 = vector.shape_cast %38 : vector<16xf32> to vector<16x1xf32>
    %40 = vector.broadcast %39 : vector<16x1xf32> to vector<16x16xf32>
    %41 = arith.subf %37, %40 : vector<16x16xf32>
    %42 = math.exp %41 : vector<16x16xf32>
    %cst_15 = arith.constant dense<0.000000e+00> : vector<16xf32>
    %43 = vector.multi_reduction <add>, %42, %cst_15 [1] : vector<16x16xf32> to vector<16xf32>
    %44 = vector.shape_cast %43 : vector<16xf32> to vector<16x1xf32>
    %45 = tpu.reciprocal %44 {approx = true} : vector<16x1xf32> -> vector<16x1xf32>
    %46 = vector.broadcast %45 : vector<16x1xf32> to vector<16x16xf32>
    %47 = arith.mulf %42, %46 : vector<16x16xf32>
    %48 = arith.truncf %47 : vector<16x16xf32> to vector<16x16xbf16>
    %cst_16 = arith.constant dense<0.000000e+00> : vector<16x128xf32>
    %49 = tpu.matmul %48, %36, %cst_16 {dimension_numbers = #tpu.dot_dimension_numbers<[1], [0], [0], [1], [0, 0, 1, 1], [], []>} : vector<16x16xbf16>, vector<16x128xbf16>, vector<16x128xf32> -> vector<16x128xf32>
    %50 = tpu.concatenate %33, %49 in 0 : vector<16x128xf32>, vector<16x128xf32> -> vector<32x128xf32>
    %51 = vector.extract_strided_slice %11 {offsets = [0, 384], sizes = [32, 128], strides = [1, 1]} : vector<32x768xf32> to vector<32x128xf32>
    %52 = arith.truncf %51 : vector<32x128xf32> to vector<32x128xbf16>
    %53 = vector.extract_strided_slice %11 {offsets = [0, 512], sizes = [32, 128], strides = [1, 1]} : vector<32x768xf32> to vector<32x128xf32>
    %54 = arith.truncf %53 : vector<32x128xf32> to vector<32x128xbf16>
    %55 = vector.extract_strided_slice %11 {offsets = [0, 640], sizes = [32, 128], strides = [1, 1]} : vector<32x768xf32> to vector<32x128xf32>
    %56 = arith.truncf %55 : vector<32x128xf32> to vector<32x128xbf16>
    %57 = vector.extract_strided_slice %52 {offsets = [0, 0], sizes = [16, 128], strides = [1, 1]} : vector<32x128xbf16> to vector<16x128xbf16>
    %58 = vector.extract_strided_slice %54 {offsets = [0, 0], sizes = [16, 128], strides = [1, 1]} : vector<32x128xbf16> to vector<16x128xbf16>
    %59 = vector.extract_strided_slice %56 {offsets = [0, 0], sizes = [16, 128], strides = [1, 1]} : vector<32x128xbf16> to vector<16x128xbf16>
    %cst_17 = arith.constant dense<0.000000e+00> : vector<16x16xf32>
    %60 = tpu.matmul %57, %58, %cst_17 {dimension_numbers = #tpu.dot_dimension_numbers<[1], [1], [0], [0], [0, 0, 1, 0], [], []>} : vector<16x128xbf16>, vector<16x128xbf16>, vector<16x16xf32> -> vector<16x16xf32>
    %cst_18 = arith.constant dense<0xFF800000> : vector<16xf32>
    %61 = vector.multi_reduction <maximumf>, %60, %cst_18 [1] : vector<16x16xf32> to vector<16xf32>
    %62 = vector.shape_cast %61 : vector<16xf32> to vector<16x1xf32>
    %63 = vector.broadcast %62 : vector<16x1xf32> to vector<16x16xf32>
    %64 = arith.subf %60, %63 : vector<16x16xf32>
    %65 = math.exp %64 : vector<16x16xf32>
    %cst_19 = arith.constant dense<0.000000e+00> : vector<16xf32>
    %66 = vector.multi_reduction <add>, %65, %cst_19 [1] : vector<16x16xf32> to vector<16xf32>
    %67 = vector.shape_cast %66 : vector<16xf32> to vector<16x1xf32>
    %68 = tpu.reciprocal %67 {approx = true} : vector<16x1xf32> -> vector<16x1xf32>
    %69 = vector.broadcast %68 : vector<16x1xf32> to vector<16x16xf32>
    %70 = arith.mulf %65, %69 : vector<16x16xf32>
    %71 = arith.truncf %70 : vector<16x16xf32> to vector<16x16xbf16>
    %cst_20 = arith.constant dense<0.000000e+00> : vector<16x128xf32>
    %72 = tpu.matmul %71, %59, %cst_20 {dimension_numbers = #tpu.dot_dimension_numbers<[1], [0], [0], [1], [0, 0, 1, 1], [], []>} : vector<16x16xbf16>, vector<16x128xbf16>, vector<16x128xf32> -> vector<16x128xf32>
    %73 = vector.extract_strided_slice %52 {offsets = [16, 0], sizes = [16, 128], strides = [1, 1]} : vector<32x128xbf16> to vector<16x128xbf16>
    %74 = vector.extract_strided_slice %54 {offsets = [16, 0], sizes = [16, 128], strides = [1, 1]} : vector<32x128xbf16> to vector<16x128xbf16>
    %75 = vector.extract_strided_slice %56 {offsets = [16, 0], sizes = [16, 128], strides = [1, 1]} : vector<32x128xbf16> to vector<16x128xbf16>
    %cst_21 = arith.constant dense<0.000000e+00> : vector<16x16xf32>
    %76 = tpu.matmul %73, %74, %cst_21 {dimension_numbers = #tpu.dot_dimension_numbers<[1], [1], [0], [0], [0, 0, 1, 0], [], []>} : vector<16x128xbf16>, vector<16x128xbf16>, vector<16x16xf32> -> vector<16x16xf32>
    %cst_22 = arith.constant dense<0xFF800000> : vector<16xf32>
    %77 = vector.multi_reduction <maximumf>, %76, %cst_22 [1] : vector<16x16xf32> to vector<16xf32>
    %78 = vector.shape_cast %77 : vector<16xf32> to vector<16x1xf32>
    %79 = vector.broadcast %78 : vector<16x1xf32> to vector<16x16xf32>
    %80 = arith.subf %76, %79 : vector<16x16xf32>
    %81 = math.exp %80 : vector<16x16xf32>
    %cst_23 = arith.constant dense<0.000000e+00> : vector<16xf32>
    %82 = vector.multi_reduction <add>, %81, %cst_23 [1] : vector<16x16xf32> to vector<16xf32>
    %83 = vector.shape_cast %82 : vector<16xf32> to vector<16x1xf32>
    %84 = tpu.reciprocal %83 {approx = true} : vector<16x1xf32> -> vector<16x1xf32>
    %85 = vector.broadcast %84 : vector<16x1xf32> to vector<16x16xf32>
    %86 = arith.mulf %81, %85 : vector<16x16xf32>
    %87 = arith.truncf %86 : vector<16x16xf32> to vector<16x16xbf16>
    %cst_24 = arith.constant dense<0.000000e+00> : vector<16x128xf32>
    %88 = tpu.matmul %87, %75, %cst_24 {dimension_numbers = #tpu.dot_dimension_numbers<[1], [0], [0], [1], [0, 0, 1, 1], [], []>} : vector<16x16xbf16>, vector<16x128xbf16>, vector<16x128xf32> -> vector<16x128xf32>
    %89 = tpu.concatenate %72, %88 in 0 : vector<16x128xf32>, vector<16x128xf32> -> vector<32x128xf32>
    %90 = tpu.concatenate %50, %89 in 1 : vector<32x128xf32>, vector<32x128xf32> -> vector<32x256xf32>
    %91 = arith.truncf %90 : vector<32x256xf32> to vector<32x256xbf16>
    %c0_25 = arith.constant 0 : index
    %c0_26 = arith.constant 0 : index
    %c0_27 = arith.constant 0 : index
    %92 = vector.load %arg5[%c0_25, %c0_26, %c0_27] : memref<1x256x512xbf16, #tpu.memory_space<vmem>>, vector<1x256x512xbf16>
    %93 = vector.shape_cast %92 : vector<1x256x512xbf16> to vector<256x512xbf16>
    %cst_28 = arith.constant dense<0.000000e+00> : vector<32x512xf32>
    %94 = tpu.matmul %91, %93, %cst_28 {dimension_numbers = #tpu.dot_dimension_numbers<[1], [0], [0], [1], [0, 0, 1, 1], [], []>} : vector<32x256xbf16>, vector<256x512xbf16>, vector<32x512xf32> -> vector<32x512xf32>
    %c0_29 = arith.constant 0 : index
    %c0_30 = arith.constant 0 : index
    %c0_31 = arith.constant 0 : index
    %95 = vector.load %arg7[%c0_29, %c0_30, %c0_31] : memref<2x16x512xf32, #tpu.memory_space<vmem>>, vector<2x16x512xf32>
    %96 = vector.shape_cast %94 : vector<32x512xf32> to vector<2x16x512xf32>
    %97 = arith.addf %95, %96 : vector<2x16x512xf32>
    %c0_32 = arith.constant 0 : index
    %c0_33 = arith.constant 0 : index
    %c0_34 = arith.constant 0 : index
    %98 = vector.load %arg7[%c0_32, %c0_33, %c0_34] : memref<2x16x512xf32, #tpu.memory_space<vmem>>, vector<2x16x512xf32>
    tpu.vector_store %arg7[%c0_32, %c0_33, %c0_34], %97 {strides = array<i32>} : memref<2x16x512xf32, #tpu.memory_space<vmem>>, vector<2x16x512xf32>,
    return
  }
  func.func @transform_0(%arg0: i32, %arg1: i32) -> (i32, i32, i32) {
    %c0_i32 = arith.constant 0 : i32
    %c0_i32_0 = arith.constant 0 : i32
    %c0_i32_1 = arith.constant 0 : i32
    return %arg0, %c0_i32, %c0_i32_0 : i32, i32, i32
  }
  func.func @transform_1(%arg0: i32, %arg1: i32) -> (i32, i32, i32) {
    %c0_i32 = arith.constant 0 : i32
    %c0_i32_0 = arith.constant 0 : i32
    %c0_i32_1 = arith.constant 0 : i32
    return %arg1, %c0_i32, %c0_i32_0 : i32, i32, i32
  }
  func.func @transform_2(%arg0: i32, %arg1: i32) -> (i32, i32, i32) {
    %c0_i32 = arith.constant 0 : i32
    %c0_i32_0 = arith.constant 0 : i32
    %c0_i32_1 = arith.constant 0 : i32
    return %arg1, %c0_i32, %c0_i32_0 : i32, i32, i32
  }
  func.func @transform_3(%arg0: i32, %arg1: i32) -> (i32, i32, i32) {
    %c0_i32 = arith.constant 0 : i32
    %c0_i32_0 = arith.constant 0 : i32
    %c0_i32_1 = arith.constant 0 : i32
    return %arg1, %c0_i32, %c0_i32_0 : i32, i32, i32
  }
  func.func @transform_4(%arg0: i32, %arg1: i32) -> (i32, i32) {
    %c0_i32 = arith.constant 0 : i32
    %c0_i32_0 = arith.constant 0 : i32
    %c0_i32_1 = arith.constant 0 : i32
    return %c0_i32, %c0_i32_0 : i32, i32
  }
  func.func @transform_5(%arg0: i32, %arg1: i32) -> (i32, i32, i32) {
    %c0_i32 = arith.constant 0 : i32
    %c0_i32_0 = arith.constant 0 : i32
    %c0_i32_1 = arith.constant 0 : i32
    return %arg0, %c0_i32, %c0_i32_0 : i32, i32, i32
  }
}

</mosaic_0001>

<bundles_post_ra>
// kernel: tpu_custom_call.1
= control target key start
LH: loop header
LB: loop body
LE: loop exit
PB: predicated region body
PF: predicated region fallthrough
CT: control target
= control target key end

     0   :  { %s5388_s0 = inlined_call_operand.hbm [shape: bf16[4,16,512], index: 0, kind: input, shape index: {}]   ;;  %s5389_s1 = inlined_call_operand.hbm [shape: bf16[2,512,768], index: 1, kind: input, shape index: {}]   ;;  %s5390_s2 = inlined_call_operand.hbm [shape: f32[2,1,768], index: 2, kind: input, shape index: {}]   ;;  %s5391_s3 = inlined_call_operand.hbm [shape: bf16[2,256,512], index: 3, kind: input, shape index: {}]   ;;  %s5392_s4 = inlined_call_operand.hbm [shape: f32[1,512], index: 4, kind: input, shape index: {}]   ;;  %s5393_s5 = inlined_call_operand.hbm [shape: f32[4,16,512], index: 5, kind: output, shape index: {}]  }
   0x1   :  { %5414 = sst [smem:[#allocation28_spill]] %s5388_s0 }
   0x2   :  { %5415 = sst [smem:[#allocation29_spill]] %s5389_s1 }
   0x3   :  { %5416 = sst [smem:[#allocation30_spill]] %s5392_s4 }
   0x4   :  { %5417 = sst [smem:[#allocation31_spill]] %s5393_s5 }
   0x5   :  { %10 = vsyncpa [#allocation3], 0 }
   0x6   :  { %12 = vsyncpa [#allocation3 + $0x1], 0 }
   0x7   :  { %13 = vsyncpa [#allocation6], 0 }
   0x8   :  { %15 = vsyncpa [#allocation6 + $0x1], 0 }
   0x9   :  { %16 = vsyncpa [#allocation9], 0 }
   0xa   :  { %18 = vsyncpa [#allocation9 + $0x1], 0 }
   0xb   :  { %19 = vsyncpa [#allocation4], 0 }
   0xc   :  { %21 = vsyncpa [#allocation4 + $0x1], 0  ;;  %s4450_s18 = smov 0   ;;  %s4452_s19 = smov 0  }
   0xd   :  { %s4454_s20 = smov 0   ;;  %s4456_s21 = smov 0  }
   0xe   :  { %s4458_s22 = smov 0   ;;  %s4460_s23 = smov 0  }
   0xf   :  { %s4462_s24 = smov 0   ;;  %s4464_s25 = smov 0  }
  0x10   :  { %s4466_s26 = smov 0   ;;  %s4468_s27 = smov 0  }
  0x11   :  { %s4470_s28 = smov 0  }
  0x12 LB: > { %5418 = sst [smem:[#allocation17_spill]] %s4376_s21  ;;  %s4504_s29 = sadd.s32 4294967295, %s4404_s28   ;;  %s4404_s28 = sphi %s4470_s28, %s27_s28   ;;  %s4400_s27 = sphi %s4468_s27, %s5473_s27   ;;  %s4396_s26 = sphi %s4466_s26, %s5480_s26   ;;  %s4392_s25 = sphi %s4464_s25, %s5471_s25   ;;  %s4388_s24 = sphi %s4462_s24, %s5479_s24   ;;  %s4384_s23 = sphi %s4460_s23, %s5470_s23   ;;  %s4380_s22 = sphi %s4458_s22, %s5478_s22   ;;  %s4376_s21 = sphi %s4456_s21, %s5477_s21   ;;  %s4372_s20 = sphi %s4454_s20, %s5476_s20   ;;  %s4368_s19 = sphi %s4452_s19, %s5475_s19   ;;  %s4364_s18 = sphi %s4450_s18, %s5474_s18  }
  0x13   : > { %5419 = sst [smem:[#allocation18_spill]] %s4384_s23  ;;  %s3140_s30 = sadd.s32 4294967294, %s4404_s28  }
  0x14   : > { %5420 = sst [smem:[#allocation19_spill]] %s4388_s24  ;;  %p53_p0 = scmp.ne.s32.totalorder %s4384_s23, %s4380_s22 }
  0x15   : > { %5421 = sst [smem:[#allocation20_spill]] %s4392_s25  ;;  %p54_p1 = scmp.eq.s32.totalorder %s4404_s28, 0 }
  0x16   : > { %5422 = sst [smem:[#allocation21_spill]] %s4400_s27  ;;  %p59_p2 = scmp.ne.s32.totalorder %s4380_s22, %s4376_s21 }
  0x17   : > { %p5400_p3 = scmp.eq.s32.totalorder %s4504_s29, 0  ;;  %p4518_p4 = por %p54_p1, %p53_p0 }
  0x18   : > { %p79_p5 = scmp.ne.s32.totalorder %s4372_s20, %s4368_s19  ;;  %p85_p7 = scmp.ne.s32.totalorder %s4368_s19, %s4364_s18 }
  0x19   : > { %s5423_s8 = scalar_select %p4518_p4, 1, 0 }
  0x1a   : > { %p4529_p6 = por %p5400_p3, %p59_p2  ;;  %p4534_p8 = por %p79_p5, %p54_p1 }
  0x1b   : > { %p182_p9 = scmp.eq.s32.totalorder %s4504_s29, 3  ;;  %p4541_p10 = por %p85_p7, %p5400_p3 }
  0x1c   : > { %s5424_s9 = scalar_select %p4529_p6, 1, 0 }
  0x1d   : > { %s5425_s10 = scalar_select %p4534_p8, 1, 0 }
  0x1e   : > { %s5426_s11 = scalar_select %p4541_p10, 1, 0 }
  0x1f   : > { %p188_p11 = scmp.eq.s32.totalorder %s3140_s30, 3  ;;  %p4548_p12 = por %p182_p9, %p53_p0 }
  0x20   : > { %5427 = sst [smem:[#allocation22_spill]] %s5426_s11  ;;  %p3141_p13 = scmp.ge.s32.totalorder %s4404_s28, 1 }
  0x21   : > { %s5428_s12 = scalar_select %p4548_p12, 1, 0 }
  0x22   : > { %p4556_p1 = por %p188_p11, %p59_p2  ;;  %p195_p5 = scmp.lt.s32.totalorder %s4404_s28, 5 }
  0x23   : > { %5429 = sst [smem:[#allocation23_spill]] %s5428_s12  ;;  %s4406_s15 = smov [#allocation10]  }
  0x24   : > { %s5430_s13 = scalar_select %p4556_p1, 1, 0 }
  0x25   : > { %p4561_p6 = pnand %p3141_p13, %p195_p5  ;;  %s208_s16 = sshll.u32 %s4406_s15, 4  ;;  %s209_s16 = int_to_ptr.vmem [resolvable:$true] %s208_s16 }
  0x26   : > { %5431 = sst [smem:[#allocation24_spill]] %s5430_s13  ;;  %s5404_s30 = sand.u32 1, %s4404_s28  }
  0x27   : > { %s5432_s14 = scalar_select %p4561_p6, 1, 0 }
  0x28   : > { %p3570_p0 = pneg %p4561_p6  ;;  %s4577_s6 = sand.u32 1, %s4372_s20  }
  0x29   : > { %s5434_s4 = sld [smem:[#allocation30_spill]] }
  0x2a   : > { %p4570_p9 = pnand %p3570_p0, %p5400_p3 }
  0x2c   : > { %p4124_p11 = pneg %p4570_p9 }
  0x2f   : > { %s4122_s21 = scalar_lea.hbm %s5434_s4, 64 }
  0x30   : > { %p4123_p2 = scmp.ne.s32.totalorder %s5434_s4, %s4122_s21  ;;  %p4129_p0 = scmp.lt.u32.totalorder %s4122_s21, %s5434_s4 }
  0x32   : > { %p4125_p13 = pnand %p4124_p11, %p4123_p2 }
  0x34   : > { %p4126_p5 = pneg %p4125_p13 }
  0x36   : > { %p4131_p3 = pnand %p4129_p0, %p4126_p5 }
  0x38   : > { %4134 = shalt.err (!%p4131_p3)
}
  0x39   : > { %s4135_s18 = scalar_lea.vmem %s209_s16, 64  ;;  %p4143_p10 = scmp.lt.s32.totalorder %s209_s16, %s209_s16 }
  0x3a   : > { %p4136_p7 = scmp.ne.s32.totalorder %s209_s16, %s4135_s18  ;;  %p4144_p6 = scmp.lt.s32.totalorder %s4135_s18, %s4135_s18 }
  0x3c   : > { %p4138_p1 = pnand %p4136_p7, %p4124_p11  ;;  %p4145_p4 = por %p4144_p6, %p4143_p10 }
  0x3e   : > { %p4139_p12 = pneg %p4138_p1 }
  0x40   : > { %p4146_p8 = pnand %p4145_p4, %p4139_p12 }
  0x42   : > { %4149 = shalt.err (!%p4146_p8)
}
  0x43   : > { %3573 = dma.hbm_to_vmem [thread:$0]  (!%p4570_p9), %s5434_s4, 64, %s209_s16, [#allocation9]  }
  0x44   : > { %s3550_s21 = smul.u32 1536, %s4577_s6  ;;  %p5435_p3 = scmp.ne.s32.totalorder %s5425_s10, 0 }
  0x45   : > { %p5436_p7 = scmp.lt.s32.totalorder %s4404_s28, 4  ;;  %s3551_s12 = smul.u32 24576, %s4396_s26 }
  0x46   : > { %s5438_s1 = sld [smem:[#allocation29_spill]]  ;;  %s245_s15 = scalar_lea.vmem [#allocation5], %s3550_s21 }
  0x47   : > { %p4600_p1 = pnand %p5436_p7, %p5435_p3  ;;  %s252_s16 = sshll.u32 %s245_s15, 4  ;;  %s4610_s16 = int_to_ptr.vmem [resolvable:$true] %s252_s16 }
  0x48   : > { %s4614_s10 = scalar_lea.sflag [#allocation6], %s5404_s30 }
  0x49   : > { %s5437_s25 = scalar_select %p4600_p1, 1, 0 }
  0x4a   : > { %p4620_p6 = pneg %p4600_p1 }
  0x4c   : > { %s4608_s18 = scalar_lea.hbm %s5438_s1, %s3551_s12  ;;  %s4155_s21 = scalar_lea.hbm %s5438_s1, 49152 }
  0x4d   : > { %s4150_s5 = scalar_lea.hbm %s4608_s18, 24576  ;;  %p4156_p12 = scmp.lt.u32.totalorder %s4608_s18, %s5438_s1 }
  0x4e   : > { %p4151_p4 = scmp.ne.s32.totalorder %s4608_s18, %s4150_s5  ;;  %p4157_p9 = scmp.lt.u32.totalorder %s4155_s21, %s4150_s5 }
  0x4f   : > { %p4159_p11 = scmp.lt.u32.totalorder %s4150_s5, %s4608_s18 }
  0x50   : > { %p4153_p8 = pnand %p4620_p6, %p4151_p4  ;;  %p4158_p2 = por %p4157_p9, %p4156_p12 }
  0x52   : > { %p4154_p10 = pneg %p4153_p8  ;;  %p4160_p13 = por %p4159_p11, %p4158_p2 }
  0x54   : > { %p4161_p5 = pnand %p4160_p13, %p4154_p10 }
  0x56   : > { %4164 = shalt.err (!%p4161_p5)
}
  0x57   : > { %s4165_s30 = scalar_lea.vmem %s4610_s16, 24576  ;;  %s4407_s12 = smov [#allocation5]  }
  0x58   : > { %p4166_p0 = scmp.ne.s32.totalorder %s4610_s16, %s4165_s30  ;;  %s4170_s13 = sshll.u32 %s4407_s12, 4  ;;  %s4171_s13 = int_to_ptr.vmem [resolvable:$false] %s4170_s13 }
  0x59   : > { %s4172_s17 = scalar_lea.vmem %s4171_s13, 49152  ;;  %p4173_p4 = scmp.lt.s32.totalorder %s4610_s16, %s4171_s13 }
  0x5a   : > { %p4168_p3 = pnand %p4166_p0, %p4620_p6  ;;  %p4174_p8 = scmp.lt.s32.totalorder %s4172_s17, %s4165_s30 }
  0x5c   : > { %p4169_p7 = pneg %p4168_p3  ;;  %p4175_p12 = por %p4174_p8, %p4173_p4 }
  0x5e   : > { %p4176_p9 = pnand %p4175_p12, %p4169_p7 }
  0x60   : > { %4179 = shalt.err (!%p4176_p9)
}
  0x61   : > { %s4408_s5 = smov 384   ;;  %s4409_s21 = smov 24  }
  0x62   : > { %3580 = dma.hbm_to_vmem [thread:$0]  (!%p4600_p1), %s4608_s18, 24576, %s4610_s16, %s4614_s10, %s4408_s5, %s4408_s5, %s4409_s21  }
  0x63   : > { %s5440_s30 = sadd.s32 1, %s4396_s26  ;;  %s39_s15 = sadd.s32 1, %s4400_s27 }
  0x64   : > { %p37_p10 = scmp.ge.s32.totalorder %s5440_s30, 2  ;;  %s219_s12 = sand.u32 1, %s4384_s23  }
  0x65   : > { %s5441_s13 = smov %s5440_s30  ;;  %s3144_s1 = sshll.u32 %s219_s12, 6 }
  0x66   : > { %s5482_s13 = smov (%p37_p10, %s5441_s13), 0  ;;  %s5484_s15 = smov (!%p37_p10, %s39_s15), %s4400_s27 }
  0x67   : > { %5442 = sst [smem:[#allocation25_spill]] %s5482_s13  ;;  %s69_s17 = ssub.s32 %s4396_s26, %s5482_s13 }
  0x68   : > { %p41_p2 = scmp.ge.s32.totalorder %s5484_s15, 2  ;;  %p70_p11 = scmp.eq.s32.totalorder %s69_s17, 0 }
  0x69   : > { %s3434_s4 = sshll.u32 %s4400_s27, 10  ;;  %s5444_s18 = sadd.s32 1, %s4372_s20 }
  0x6a   : > { %s5486_s15 = smov (%p41_p2, %s5484_s15), 0  ;;  %s5445_s0 = sld [smem:[#allocation28_spill]] }
  0x6b   : > { %5443 = sst [smem:[#allocation26_spill]] %s5486_s15  ;;  %s43_s5 = ssub.s32 %s4400_s27, %s5486_s15 }
  0x6c   : > { %s4661_s16 = scalar_select %p70_p11, %s4372_s20, %s5444_s18  }
  0x6d   : > { %p44_p13 = scmp.eq.s32.totalorder %s43_s5, 0  ;;  %s223_s17 = scalar_lea.vmem [#allocation2], %s3144_s1 }
  0x6e   : > { %s231_s13 = sshll.u32 %s223_s17, 4  ;;  %p5446_p5 = scmp.ne.s32.totalorder %s5423_s8, 0  ;;  %s4683_s13 = int_to_ptr.vmem [resolvable:$true] %s231_s13 }
  0x6f   : > { %p5447_p0 = scmp.lt.s32.totalorder %s4404_s28, 4  ;;  %s5449_s18 = sadd.s32 1, %s4384_s23 }
  0x70   : > { %s4668_s24 = scalar_lea.hbm %s5445_s0, %s3434_s4  ;;  %s4685_s4 = scalar_lea.sflag [#allocation3], %s219_s12 }
  0x71   : > { %p4674_p3 = pnand %p5447_p0, %p5446_p5  ;;  %s4180_s21 = scalar_lea.hbm %s4668_s24, 1024 }
  0x72   : > { %s4681_s5 = scalar_select %p44_p13, %s4384_s23, %s5449_s18  }
  0x73   : > { %p4181_p7 = scmp.ne.s32.totalorder %s4668_s24, %s4180_s21  ;;  %p4182_p4 = pneg %p4674_p3 }
  0x74   : > { %5450 = sst [smem:[#allocation27_spill]] %s4681_s5  ;;  %s4185_s30 = scalar_lea.hbm %s5445_s0, 2048 }
  0x75   : > { %p4183_p8 = pnand %p4182_p4, %p4181_p7  ;;  %p4186_p9 = scmp.lt.u32.totalorder %s4668_s24, %s5445_s0 }
  0x76   : > { %p4187_p10 = scmp.lt.u32.totalorder %s4185_s30, %s4180_s21  ;;  %p4189_p11 = scmp.lt.u32.totalorder %s4180_s21, %s4668_s24 }
  0x77   : > { %p4184_p12 = pneg %p4183_p8 }
  0x78   : > { %p4188_p2 = por %p4187_p10, %p4186_p9 }
  0x7a   : > { %p4190_p13 = por %p4189_p11, %p4188_p2 }
  0x7c   : > { %p4191_p5 = pnand %p4190_p13, %p4184_p12 }
  0x7e   : > { %4194 = shalt.err (!%p4191_p5)
}
  0x7f   : > { %s4195_s12 = scalar_lea.vmem %s4683_s13, 1024  ;;  %s4410_s18 = smov [#allocation2]  }
  0x80   : > { %p4196_p0 = scmp.ne.s32.totalorder %s4683_s13, %s4195_s12  ;;  %s4200_s1 = sshll.u32 %s4410_s18, 4  ;;  %s4201_s1 = int_to_ptr.vmem [resolvable:$false] %s4200_s1 }
  0x81   : > { %s4202_s15 = scalar_lea.vmem %s4201_s1, 2048  ;;  %p4203_p1 = scmp.lt.s32.totalorder %s4683_s13, %s4201_s1 }
  0x82   : > { %p4198_p7 = pnand %p4196_p0, %p4182_p4  ;;  %p4204_p9 = scmp.lt.s32.totalorder %s4202_s15, %s4195_s12 }
  0x84   : > { %p4199_p8 = pneg %p4198_p7  ;;  %p4205_p10 = por %p4204_p9, %p4203_p1 }
  0x86   : > { %p4206_p2 = pnand %p4205_p10, %p4199_p8 }
  0x88   : > { %4209 = shalt.err (!%p4206_p2)
}
  0x89   : > { %s5413_s21 = smov 256   ;;  %s4412_s8 = smov 16  }
  0x8a   : > { %3577 = dma.hbm_to_vmem [thread:$0]  (!%p4674_p3), %s4668_s24, 1024, %s4683_s13, %s4685_s4, %s5413_s21, %s5413_s21, %s4412_s8  }
  0x8b   : > { %s3552_s30 = smul.u32 6, %s4577_s6  ;;  %s3150_s17 = sshll.u32 %s4577_s6, 9 }
  0x8c   : > { %s3553_s12 = smul.u32 96, %s4396_s26  ;;  %s3435_s18 = sshll.u32 %s4396_s26, 13 }
  0x8d   : > { %s266_s27 = scalar_lea.vmem [#allocation7], %s3552_s30  ;;  %s4728_s24 = scalar_lea.hbm %s5391_s3, %s3435_s18 }
  0x8e   : > { %s4723_s0 = scalar_lea.hbm %s5390_s2, %s3553_s12  ;;  %s274_s5 = sshll.u32 %s266_s27, 4  ;;  %s275_s5 = int_to_ptr.vmem [resolvable:$true] %s274_s5 }
  0x8f   : > { %s4210_s13 = scalar_lea.hbm %s4723_s0, 96  ;;  %s4215_s1 = scalar_lea.hbm %s5390_s2, 192 }
  0x90   : > { %p4211_p1 = scmp.ne.s32.totalorder %s4723_s0, %s4210_s13  ;;  %p4216_p12 = scmp.lt.u32.totalorder %s4723_s0, %s5390_s2 }
  0x91   : > { %p4217_p11 = scmp.lt.u32.totalorder %s4215_s1, %s4210_s13  ;;  %p4219_p5 = scmp.lt.u32.totalorder %s4210_s13, %s4723_s0 }
  0x92   : > { %p4213_p3 = pnand %p4211_p1, %p4620_p6 }
  0x93   : > { %p4218_p13 = por %p4217_p11, %p4216_p12 }
  0x94   : > { %p4214_p4 = pneg %p4213_p3 }
  0x95   : > { %p4220_p0 = por %p4219_p5, %p4218_p13 }
  0x97   : > { %p4221_p7 = pnand %p4220_p0, %p4214_p4 }
  0x99   : > { %4224 = shalt.err (!%p4221_p7)
}
  0x9a   : > { %s4225_s23 = scalar_lea.vmem %s275_s5, 96  ;;  %s4413_s27 = smov [#allocation7]  }
  0x9b   : > { %p4226_p8 = scmp.ne.s32.totalorder %s275_s5, %s4225_s23  ;;  %s4230_s30 = sshll.u32 %s4413_s27, 4  ;;  %s4231_s30 = int_to_ptr.vmem [resolvable:$false] %s4230_s30 }
  0x9c   : > { %s4232_s18 = scalar_lea.vmem %s4231_s30, 192  ;;  %p4233_p2 = scmp.lt.s32.totalorder %s275_s5, %s4231_s30 }
  0x9d   : > { %p4228_p9 = pnand %p4226_p8, %p4620_p6  ;;  %p4234_p1 = scmp.lt.s32.totalorder %s4232_s18, %s4225_s23 }
  0x9f   : > { %p4229_p10 = pneg %p4228_p9  ;;  %p4235_p3 = por %p4234_p1, %p4233_p2 }
  0xa1   : > { %p4236_p11 = pnand %p4235_p3, %p4229_p10 }
  0xa3   : > { %4239 = shalt.err (!%p4236_p11)
}
  0xa4   : > { %p5451_p12 = scmp.ne.s32.totalorder %s5437_s25, 0  ;;  %s285_s21 = scalar_lea.vmem [#allocation8], %s3150_s17 }
  0xa5   : > { %s292_s11 = sshll.u32 %s285_s21, 4  ;;  %s5452_s13 = sand.u32 1, %s4404_s28   ;;  %s4750_s11 = int_to_ptr.vmem [resolvable:$true] %s292_s11 }
  0xa6   : > { %3583 = dma.hbm_to_vmem [thread:$0]  (!%p5451_p12), %s4723_s0, 96, %s275_s5, %s4614_s10  }
  0xa7   : > { %s4754_s4 = scalar_lea.sflag [#allocation9], %s5452_s13  ;;  %s4240_s12 = scalar_lea.hbm %s4728_s24, 8192 }
  0xa8   : > { %p4241_p4 = scmp.ne.s32.totalorder %s4728_s24, %s4240_s12  ;;  %s4245_s23 = scalar_lea.hbm %s5391_s3, 16384 }
  0xa9   : > { %p4246_p0 = scmp.lt.u32.totalorder %s4728_s24, %s5391_s3  ;;  %p4247_p7 = scmp.lt.u32.totalorder %s4245_s23, %s4240_s12 }
  0xaa   : > { %p4243_p13 = pnand %p4241_p4, %p4620_p6  ;;  %p4249_p9 = scmp.lt.u32.totalorder %s4240_s12, %s4728_s24 }
  0xab   : > { %p4248_p8 = por %p4247_p7, %p4246_p0 }
  0xac   : > { %p4244_p5 = pneg %p4243_p13 }
  0xad   : > { %p4250_p10 = por %p4249_p9, %p4248_p8 }
  0xaf   : > { %p4251_p2 = pnand %p4250_p10, %p4244_p5 }
  0xb1   : > { %4254 = shalt.err (!%p4251_p2)
}
  0xb2   : > { %s4255_s0 = scalar_lea.vmem %s4750_s11, 8192  ;;  %s4414_s6 = smov [#allocation8]  }
  0xb3   : > { %p4256_p1 = scmp.ne.s32.totalorder %s4750_s11, %s4255_s0  ;;  %s4260_s10 = sshll.u32 %s4414_s6, 4  ;;  %s4261_s10 = int_to_ptr.vmem [resolvable:$false] %s4260_s10 }
  0xb4   : > { %s4262_s5 = scalar_lea.vmem %s4261_s10, 16384  ;;  %p4263_p4 = scmp.lt.s32.totalorder %s4750_s11, %s4261_s10 }
  0xb5   : > { %p4258_p3 = pnand %p4256_p1, %p4620_p6  ;;  %p4264_p13 = scmp.lt.s32.totalorder %s4262_s5, %s4255_s0 }
  0xb7   : > { %p4259_p11 = pneg %p4258_p3  ;;  %p4265_p0 = por %p4264_p13, %p4263_p4 }
  0xb9   : > { %p4266_p7 = pnand %p4265_p0, %p4259_p11 }
  0xbb   : > { %4269 = shalt.err (!%p4266_p7)
}
  0xbc   : > { %s5453_s17 = smov 256   ;;  %p5454_p6 = scmp.ne.s32.totalorder %s5432_s14, 0 }
  0xbd   : > { %3586 = dma.hbm_to_vmem [thread:$0]  (!%p5451_p12), %s4728_s24, 8192, %s4750_s11, %s4754_s4, %s5453_s17, %s5453_s17, %s4412_s8  }
  0xbe   : > { %304 = sbr.rel (%p5454_p6) target bundleno = 3187 (0xc73), region = 40  ;;  %s4784_s7 = sand.u32 (!%p5454_p6), 1, %s4380_s22  }
  0xbf   : > { %s3154_s18 = sshll.u32 (!%p5454_p6), %s4784_s7, 6  ;;  %s307_s21 = scalar_lea.sflag (!%p5454_p6), [#allocation3], %s4784_s7 }
  0xc0   : > { %s4788_s13 = scalar_lea.vmem (!%p5454_p6), [#allocation2], %s3154_s18  ;;  %p5455_p5 = scmp.ne.s32.totalorder (!%p5454_p6), %s5424_s9, 0 }
  0xc5   : > { %4343 = dma.done.wait (%p5455_p5), %s307_s21, 1024  }
  0xc6   : > { %4345 = vsyncadd (%p5455_p5), %s307_s21, 4294966272  ;;  %s5456_s25 = sld [smem:[#allocation22_spill]]  ;;  %s315_s14 = sand.u32 1, %s4504_s29  }
  0xc7   : > { %s317_s8 = sand.u32 1, %s4368_s19   ;;  %s316_s11 = scalar_lea.sflag [#allocation6], %s315_s14 }
  0xc8   : > { %s3554_s24 = smul.u32 1536, %s317_s8 }
  0xca   : > { %s4796_s4 = scalar_lea.vmem [#allocation5], %s3554_s24 }
  0xcc   : > { %p5457_p12 = scmp.ne.s32.totalorder %s5456_s25, 0 }
  0xce   : > { %4347 = dma.done.wait (%p5457_p12), %s316_s11, 24672  }
  0xcf   : > { %4349 = vsyncadd (%p5457_p12), %s316_s11, 4294942624  ;;  %s3555_s12 = smul.u32 6, %s317_s8  ;;  %s3155_s1 = sshll.u32 %s317_s8, 9 }
  0xd0   : > { %s334_s9 = scalar_lea.sflag [#allocation9], %s315_s14  ;;  %s4804_s23 = scalar_lea.vmem [#allocation8], %s3155_s1 }
  0xd1   : > { %s4802_s15 = scalar_lea.vmem [#allocation7], %s3555_s12 }
  0xd2   : > { %4351 = dma.done.wait (%p5457_p12), %s334_s9, 8192  }
  0xd3   : > { %4353 = vsyncadd (%p5457_p12), %s334_s9, 4294959104  ;;  %p5458_p8 = scmp.eq.s32.totalorder %s4504_s29, 0 }
  0xd5   : > { %4355 = dma.done.wait (%p5458_p8), [#allocation9], 64   ;;  %p5459_p9 = pmov %p5458_p8 }
  0xd6   : > { %s3157_s27 = sshll.u32 %s4784_s7, 7  ;;  %s5460_s0 = sld [smem:[#allocation19_spill]] }
  0xd7   : > { %4357 = vsyncadd (%p5459_p9), [#allocation9], 4294967232  ;;  %s4815_s30 = scalar_lea.vmem [#allocation11], %s3157_s27 }
  0xdc   : > { %p3158_p10 = scmp.ne.s32.totalorder %s5460_s0, 0 }
  0xdd   : > { %v392_v0 = vlaneseq (!%p3158_p10)  ;;  %v390_v2 = vld [vmem:[#allocation10] sm:$0xf] (!%p3158_p10) }
  0xde   : > { %389 = sbr.rel (%p3158_p10) target bundleno = 237 (0xed), region = 64 }
  0xdf   : > { %v393_v1 = vshrl.u32 (!%p3158_p10), %v392_v0, 7 }
  0xe1   : > { %v394_v3 = vsub.s32 (!%p3158_p10), 0, %v393_v1  ;;  %v398_v4 = vsub.s32 (!%p3158_p10), 1, %v393_v1  ;;  %v402_v5 = vsub.s32 (!%p3158_p10), 2, %v393_v1  ;;  %v406_v6 = vsub.s32 (!%p3158_p10), 3, %v393_v1 }
  0xe3   : > { %v395_v7 = vrot.slane (!%p3158_p10), %v390_v2, %v394_v3  ;;  %v399_v8 = vrot.slane (!%p3158_p10), %v390_v2, %v398_v4  ;;  %v403_v9 = vrot.slane (!%p3158_p10), %v390_v2, %v402_v5  ;;  %v407_v10 = vrot.slane (!%p3158_p10), %v390_v2, %v406_v6 }
  0xe5   : > { %412 = vst [vmem:[%s4815_s30] sm:$0xff] %v395_v7  ;;  %416 = vst [vmem:[%s4815_s30 + $0x20] sm:$0xff] %v395_v7 }
  0xe6   : > { %420 = vst [vmem:[%s4815_s30 + $0x40] sm:$0xff] %v395_v7  ;;  %424 = vst [vmem:[%s4815_s30 + $0x60] sm:$0xff] %v395_v7 }
  0xe7   : > { %413 = vst [vmem:[%s4815_s30 + $0x8] sm:$0xff] %v399_v8  ;;  %417 = vst [vmem:[%s4815_s30 + $0x28] sm:$0xff] %v399_v8 }
  0xe8   : > { %421 = vst [vmem:[%s4815_s30 + $0x48] sm:$0xff] %v399_v8  ;;  %425 = vst [vmem:[%s4815_s30 + $0x68] sm:$0xff] %v399_v8 }
  0xe9   : > { %414 = vst [vmem:[%s4815_s30 + $0x10] sm:$0xff] %v403_v9  ;;  %418 = vst [vmem:[%s4815_s30 + $0x30] sm:$0xff] %v403_v9 }
  0xea   : > { %422 = vst [vmem:[%s4815_s30 + $0x50] sm:$0xff] %v403_v9  ;;  %426 = vst [vmem:[%s4815_s30 + $0x70] sm:$0xff] %v403_v9 }
  0xeb   : > { %415 = vst [vmem:[%s4815_s30 + $0x18] sm:$0xff] %v407_v10  ;;  %419 = vst [vmem:[%s4815_s30 + $0x38] sm:$0xff] %v407_v10 }
  0xec   : > { %423 = vst [vmem:[%s4815_s30 + $0x58] sm:$0xff] %v407_v10  ;;  %427 = vst [vmem:[%s4815_s30 + $0x78] sm:$0xff] %v407_v10 }
  0xed PF: > { %v3692_v11 = vld [vmem:[%s4796_s4 + $0x4] ss:$24 sps:$4 sm:$0xff]   ;;  %v3694_v12 = vld [vmem:[%s4796_s4] ss:$24 sps:$4 sm:$0xff]   ;;  %v3695_v13 = vld [vmem:[%s4796_s4 + $0x34] ss:$24 sps:$4 sm:$0xff]  }
  0xee   : > { %1660 = vmatprep.subr.bf16.mxu0 %v3692_v11  ;;  %v3697_v14 = vld [vmem:[%s4796_s4 + $0x30] ss:$24 sps:$4 sm:$0xff]   ;;  %v3698_v15 = vld [vmem:[%s4796_s4 + $0x64] ss:$24 sps:$4 sm:$0xff]   ;;  %v3700_v16 = vld [vmem:[%s4796_s4 + $0x60] ss:$24 sps:$4 sm:$0xff]  }
  0xef   : > { %1661 = vmatpush1.bf16.msra.mxu0 %v3694_v12  ;;  %v3701_v17 = vld [vmem:[%s4796_s4 + $0x94] ss:$24 sps:$4 sm:$0xff]   ;;  %v3703_v18 = vld [vmem:[%s4796_s4 + $0x90] ss:$24 sps:$4 sm:$0xff]   ;;  %v3704_v19 = vld [vmem:[%s4796_s4 + $0xc4] ss:$24 sps:$4 sm:$0xff]  }
  0xf0   : > { %1662 = vmatprep.subr.bf16.mxu0 %v3695_v13  ;;  %v3706_v20 = vld [vmem:[%s4796_s4 + $0xc0] ss:$24 sps:$4 sm:$0xff]   ;;  %v3707_v21 = vld [vmem:[%s4796_s4 + $0xf4] ss:$24 sps:$4 sm:$0xff]   ;;  %v3709_v22 = vld [vmem:[%s4796_s4 + $0xf0] ss:$24 sps:$4 sm:$0xff]  }
  0xf1   : > { %v3710_v23 = vld [vmem:[%s4796_s4 + $0x124] ss:$24 sps:$4 sm:$0xff]   ;;  %v3712_v25 = vld [vmem:[%s4796_s4 + $0x120] ss:$24 sps:$4 sm:$0xff]   ;;  %v3713_v26 = vld [vmem:[%s4796_s4 + $0x154] ss:$24 sps:$4 sm:$0xff]  }
  0xf2   : > { %v4848_v24 = vld [vmem:[%s4788_s13 + $0x4] ss:$16 sps:$4 sm:$0xff]   ;;  %v3715_v27 = vld [vmem:[%s4796_s4 + $0x150] ss:$24 sps:$4 sm:$0xff]   ;;  %v3718_v29 = vld [vmem:[%s4796_s4 + $0x180] ss:$24 sps:$4 sm:$0xff]  }
  0xf3   : > { %1663 = vmatpush1.bf16.msra.mxu0 %v3697_v14  ;;  %1692 = vmatprep.mubr.bf16.mxu0 %v4848_v24  ;;  %v3716_v28 = vld [vmem:[%s4796_s4 + $0x184] ss:$24 sps:$4 sm:$0xff]   ;;  %v3719_v30 = vld [vmem:[%s4796_s4 + $0x1b4] ss:$24 sps:$4 sm:$0xff]   ;;  %v3721_v31 = vld [vmem:[%s4796_s4 + $0x1b0] ss:$24 sps:$4 sm:$0xff]  }
  0xf4   : > { %1664 = vmatprep.subr.bf16.mxu0 %v3698_v15  ;;  %1798 = vmatprep.mubr.bf16.mxu1 %v4848_v24  ;;  %v3722_v32 = vld [vmem:[%s4796_s4 + $0x1e4] ss:$24 sps:$4 sm:$0xff]   ;;  %v3724_v33 = vld [vmem:[%s4796_s4 + $0x1e0] ss:$24 sps:$4 sm:$0xff]   ;;  %v3725_v34 = vld [vmem:[%s4796_s4 + $0x214] ss:$24 sps:$4 sm:$0xff]  }
  0xf5   : > { %v3727_v35 = vld [vmem:[%s4796_s4 + $0x210] ss:$24 sps:$4 sm:$0xff]   ;;  %v3728_v36 = vld [vmem:[%s4796_s4 + $0x244] ss:$24 sps:$4 sm:$0xff]   ;;  %v3730_v37 = vld [vmem:[%s4796_s4 + $0x240] ss:$24 sps:$4 sm:$0xff]  }
  0xf6   : > { %v3731_v38 = vld [vmem:[%s4796_s4 + $0x274] ss:$24 sps:$4 sm:$0xff]   ;;  %v3802_v40 = vld [vmem:[%s4796_s4 + $0x8] ss:$24 sps:$4 sm:$0xff]   ;;  %v3734_v43 = vld [vmem:[%s4796_s4 + $0x2a4] ss:$24 sps:$4 sm:$0xff]  }
  0xf7   : > { %1665 = vmatpush1.bf16.msra.mxu0 %v3700_v16  ;;  %v3800_v39 = vld [vmem:[%s4796_s4 + $0xc] ss:$24 sps:$4 sm:$0xff]   ;;  %v3733_v41 = vld [vmem:[%s4796_s4 + $0x270] ss:$24 sps:$4 sm:$0xff]   ;;  %v3803_v42 = vld [vmem:[%s4796_s4 + $0x3c] ss:$24 sps:$4 sm:$0xff]  }
  0xf8   : > { %1666 = vmatprep.subr.bf16.mxu0 %v3701_v17  ;;  %1766 = vmatprep.subr.bf16.mxu1 %v3800_v39  ;;  %v3805_v44 = vld [vmem:[%s4796_s4 + $0x38] ss:$24 sps:$4 sm:$0xff]   ;;  %v3806_v45 = vld [vmem:[%s4796_s4 + $0x6c] ss:$24 sps:$4 sm:$0xff]   ;;  %v3808_v48 = vld [vmem:[%s4796_s4 + $0x68] ss:$24 sps:$4 sm:$0xff]  }
  0xf9   : > { %1767 = vmatpush1.bf16.msra.mxu1 %v3802_v40  ;;  %v3736_v46 = vld [vmem:[%s4796_s4 + $0x2a0] ss:$24 sps:$4 sm:$0xff]   ;;  %v3737_v47 = vld [vmem:[%s4796_s4 + $0x2d4] ss:$24 sps:$4 sm:$0xff]   ;;  %v3739_v50 = vld [vmem:[%s4796_s4 + $0x2d0] ss:$24 sps:$4 sm:$0xff]  }
  0xfa   : > { %1768 = vmatprep.subr.bf16.mxu1 %v3803_v42  ;;  %v3809_v49 = vld [vmem:[%s4796_s4 + $0x9c] ss:$24 sps:$4 sm:$0xff]   ;;  %v3811_v52 = vld [vmem:[%s4796_s4 + $0x98] ss:$24 sps:$4 sm:$0xff]   ;;  %v3812_v53 = vld [vmem:[%s4796_s4 + $0xcc] ss:$24 sps:$4 sm:$0xff]  }
  0xfb   : > { %1667 = vmatpush1.bf16.msra.mxu0 %v3703_v18  ;;  %v3744_v51 = vld [vmem:[%s4796_s4 + $0x304] ss:$24 sps:$4 sm:$0xff]   ;;  %v3742_v54 = vld [vmem:[%s4796_s4 + $0x300] ss:$24 sps:$4 sm:$0xff]   ;;  %v3748_v56 = vld [vmem:[%s4796_s4 + $0x334] ss:$24 sps:$4 sm:$0xff]  }
  0xfc   : > { %1668 = vmatprep.subr.bf16.mxu0 %v3704_v19  ;;  %v4883_v55 = vld [vmem:[%s4788_s13] ss:$16 sps:$4 sm:$0xff]   ;;  %v4887_v57 = vld [vmem:[%s4788_s13 + $0x24] ss:$16 sps:$4 sm:$0xff]   ;;  %v4903_v3 = vld [vmem:[%s4788_s13 + $0xc] ss:$16 sps:$4 sm:$0xff]  }
  0xfd   : > { %1769 = vmatpush1.bf16.msra.mxu1 %v3805_v44  ;;  %v3814_v58 = vld [vmem:[%s4796_s4 + $0xc8] ss:$24 sps:$4 sm:$0xff]   ;;  %v3815_v59 = vld [vmem:[%s4796_s4 + $0xfc] ss:$24 sps:$4 sm:$0xff]   ;;  %v3817_v62 = vld [vmem:[%s4796_s4 + $0xf8] ss:$24 sps:$4 sm:$0xff]  }
  0xfe   : > { %1770 = vmatprep.subr.bf16.mxu1 %v3806_v45  ;;  %v3746_v60 = vld [vmem:[%s4796_s4 + $0x330] ss:$24 sps:$4 sm:$0xff]   ;;  %v3751_v61 = vld [vmem:[%s4796_s4 + $0x364] ss:$24 sps:$4 sm:$0xff]   ;;  %v3749_v0 = vld [vmem:[%s4796_s4 + $0x360] ss:$24 sps:$4 sm:$0xff]  }
  0xff   : > { %1669 = vmatpush1.bf16.msra.mxu0 %v3706_v20  ;;  %v3818_v63 = vld [vmem:[%s4796_s4 + $0x12c] ss:$24 sps:$4 sm:$0xff]   ;;  %v4899_v1 = vld [vmem:[%s4788_s13 + $0x20] ss:$16 sps:$4 sm:$0xff]   ;;  %v3821_v5 = vld [vmem:[%s4796_s4 + $0x15c] ss:$24 sps:$4 sm:$0xff]  }
 0x100   : > { %1670 = vmatprep.subr.bf16.mxu0 %v3707_v21  ;;  %v3754_v2 = vld [vmem:[%s4796_s4 + $0x394] ss:$24 sps:$4 sm:$0xff]   ;;  %v3820_v4 = vld [vmem:[%s4796_s4 + $0x128] ss:$24 sps:$4 sm:$0xff]   ;;  %v3757_v7 = vld [vmem:[%s4796_s4 + $0x3c4] ss:$24 sps:$4 sm:$0xff]  }
 0x101   : > { %1771 = vmatpush1.bf16.msra.mxu1 %v3808_v48  ;;  %v3752_v6 = vld [vmem:[%s4796_s4 + $0x390] ss:$24 sps:$4 sm:$0xff]   ;;  %v3824_v9 = vld [vmem:[%s4796_s4 + $0x18c] ss:$24 sps:$4 sm:$0xff]   ;;  %v3755_v10 = vld [vmem:[%s4796_s4 + $0x3c0] ss:$24 sps:$4 sm:$0xff]  }
 0x102   : > { %1772 = vmatprep.subr.bf16.mxu1 %v3809_v49  ;;  %v3823_v8 = vld [vmem:[%s4796_s4 + $0x158] ss:$24 sps:$4 sm:$0xff]   ;;  %v3760_v11 = vld [vmem:[%s4796_s4 + $0x3f4] ss:$24 sps:$4 sm:$0xff]   ;;  %v3826_v12 = vld [vmem:[%s4796_s4 + $0x188] ss:$24 sps:$4 sm:$0xff]  }
 0x103   : > { %1671 = vmatpush1.bf16.msra.mxu0 %v3709_v22  ;;  %v3827_v13 = vld [vmem:[%s4796_s4 + $0x1bc] ss:$24 sps:$4 sm:$0xff]   ;;  %v3758_v14 = vld [vmem:[%s4796_s4 + $0x3f0] ss:$24 sps:$4 sm:$0xff]   ;;  %v3830_v17 = vld [vmem:[%s4796_s4 + $0x1ec] ss:$24 sps:$4 sm:$0xff]  }
 0x104   : > { %1672 = vmatprep.subr.bf16.mxu0 %v3710_v23  ;;  %v3763_v15 = vld [vmem:[%s4796_s4 + $0x424] ss:$24 sps:$4 sm:$0xff]   ;;  %v3829_v16 = vld [vmem:[%s4796_s4 + $0x1b8] ss:$24 sps:$4 sm:$0xff]   ;;  %v3766_v19 = vld [vmem:[%s4796_s4 + $0x454] ss:$24 sps:$4 sm:$0xff]  }
 0x105   : > { %1773 = vmatpush1.bf16.msra.mxu1 %v3811_v52  ;;  %v3761_v18 = vld [vmem:[%s4796_s4 + $0x420] ss:$24 sps:$4 sm:$0xff]   ;;  %v3833_v21 = vld [vmem:[%s4796_s4 + $0x21c] ss:$24 sps:$4 sm:$0xff]   ;;  %v3764_v22 = vld [vmem:[%s4796_s4 + $0x450] ss:$24 sps:$4 sm:$0xff]  }
 0x106   : > { %1774 = vmatprep.subr.bf16.mxu1 %v3812_v53  ;;  %v3832_v20 = vld [vmem:[%s4796_s4 + $0x1e8] ss:$24 sps:$4 sm:$0xff]   ;;  %v3769_v23 = vld [vmem:[%s4796_s4 + $0x484] ss:$24 sps:$4 sm:$0xff]   ;;  %v3784_v44 = vld [vmem:[%s4796_s4 + $0x574] ss:$24 sps:$4 sm:$0xff]  }
 0x107   : > { %1673 = vmatpush1.bf16.msra.mxu0 %v3712_v25  ;;  %v3835_v25 = vld [vmem:[%s4796_s4 + $0x218] ss:$24 sps:$4 sm:$0xff]   ;;  %v3781_v40 = vld [vmem:[%s4796_s4 + $0x544] ss:$24 sps:$4 sm:$0xff]   ;;  %v3848_v45 = vld [vmem:[%s4796_s4 + $0x308] ss:$24 sps:$4 sm:$0xff]  }
 0x108   : > { %1674 = vmatprep.subr.bf16.mxu0 %v3713_v26  ;;  %v3836_v26 = vld [vmem:[%s4796_s4 + $0x24c] ss:$24 sps:$4 sm:$0xff]   ;;  %v3776_v39 = vld [vmem:[%s4796_s4 + $0x510] ss:$24 sps:$4 sm:$0xff]   ;;  %vm4416_vm0 = vmmov 0   ;;  %vm2025_vm1 = vcmask 130048  }
 0x109   : > { %1775 = vmatpush1.bf16.msra.mxu1 %v3814_v58  ;;  %v3850_v42 = vld [vmem:[%s4796_s4 + $0x30c] ss:$24 sps:$4 sm:$0xff]   ;;  %v3851_v49 = vld [vmem:[%s4796_s4 + $0x338] ss:$24 sps:$4 sm:$0xff]   ;;  %v3854_v53 = vld [vmem:[%s4796_s4 + $0x368] ss:$24 sps:$4 sm:$0xff]  }
 0x10a   : > { %1776 = vmatprep.subr.bf16.mxu1 %v3815_v59  ;;  %v3790_v48 = vld [vmem:[%s4796_s4 + $0x5a4] ss:$24 sps:$4 sm:$0xff]   ;;  %v3793_v52 = vld [vmem:[%s4796_s4 + $0x5d4] ss:$24 sps:$4 sm:$0xff]   ;;  %s5461_s29 = sld [smem:[#allocation20_spill]]  ;;  %s2980_s10 = sshll.u32 %s4815_s30, 4  ;;  %s5319_s10 = int_to_ptr.vmem [resolvable:$true] %s2980_s10 }
 0x10b   : > { %1675 = vmatpush1.bf16.msra.mxu0 %v3715_v27  ;;  %v3767_v27 = vld [vmem:[%s4796_s4 + $0x480] ss:$24 sps:$4 sm:$0xff]   ;;  %v3862_v58 = vld [vmem:[%s4796_s4 + $0x3cc] ss:$24 sps:$4 sm:$0xff]   ;;  %s5462_s5 = sld [smem:[#allocation23_spill]]  ;;  %s5463_s21 = sld [smem:[#allocation31_spill]] }
 0x10c   : > { %1676 = vmatprep.subr.bf16.mxu0 %v3716_v28  ;;  %v3772_v28 = vld [vmem:[%s4796_s4 + $0x4b4] ss:$24 sps:$4 sm:$0xff]   ;;  %s2966_s14 = scalar_lea.sflag [#allocation4], %s4784_s7  ;;  %s4270_s8 = scalar_lea.vmem %s5319_s10, 2048 }
 0x10d   : > { %1777 = vmatpush1.bf16.msra.mxu1 %v3817_v62  ;;  %v4967_v59 = vld [vmem:[%s4788_s13 + $0x2c] ss:$16 sps:$4 sm:$0xff]   ;;  %v3863_v62 = vld [vmem:[%s4796_s4 + $0x3f8] ss:$24 sps:$4 sm:$0xff]   ;;  %p4271_p2 = scmp.ne.s32.totalorder %s5319_s10, %s4270_s8  ;;  %s4417_s24 = smov [#allocation11]  }
 0x10e   : > { %1778 = vmatprep.subr.bf16.mxu1 %v3818_v63  ;;  %v3868_v63 = vld [vmem:[%s4796_s4 + $0x42c] ss:$24 sps:$4 sm:$0xff]   ;;  %s4274_s11 = sshll.u32 %s4417_s24, 4  ;;  %s4275_s11 = int_to_ptr.vmem [resolvable:$false] %s4274_s11 }
 0x10f   : > { %1677 = vmatpush1.bf16.msra.mxu0 %v3718_v29  ;;  %v3838_v29 = vld [vmem:[%s4796_s4 + $0x248] ss:$24 sps:$4 sm:$0xff]   ;;  %p4277_p4 = scmp.lt.s32.totalorder %s5319_s10, %s4275_s11 }
 0x110   : > { %1678 = vmatprep.subr.bf16.mxu0 %v3719_v30  ;;  %v3839_v30 = vld [vmem:[%s4796_s4 + $0x27c] ss:$24 sps:$4 sm:$0xff]   ;;  %s3437_s6 = sshll.u32 %s5461_s29, 11 }
 0x111   : > { %1779 = vmatpush1.bf16.msra.mxu1 %v3820_v4  ;;  %v3871_v4 = vld [vmem:[%s4796_s4 + $0x45c] ss:$24 sps:$4 sm:$0xff]   ;;  %s5317_s25 = scalar_lea.hbm %s5463_s21, %s3437_s6  ;;  %p5465_p1 = scmp.ne.s32.totalorder %s5462_s5, 0 }
 0x112   : > { %1780 = vmatprep.subr.bf16.mxu1 %v3821_v5  ;;  %v3869_v5 = vld [vmem:[%s4796_s4 + $0x458] ss:$24 sps:$4 sm:$0xff]  }
 0x113   : > { %1679 = vmatpush1.bf16.msra.mxu0 %v3721_v31  ;;  %v3770_v31 = vld [vmem:[%s4796_s4 + $0x4b0] ss:$24 sps:$4 sm:$0xff]   ;;  %p4272_p3 = pnand %p4271_p2, %p5465_p1 }
 0x114   : > { %1680 = vmatprep.subr.bf16.mxu0 %v3722_v32  ;;  %v3775_v32 = vld [vmem:[%s4796_s4 + $0x4e4] ss:$24 sps:$4 sm:$0xff]  }
 0x115   : > { %1781 = vmatpush1.bf16.msra.mxu1 %v3823_v8  ;;  %v3877_v8 = vld [vmem:[%s4796_s4 + $0x4bc] ss:$24 sps:$4 sm:$0xff]   ;;  %p4273_p11 = pneg %p4272_p3 }
 0x116   : > { %1782 = vmatprep.subr.bf16.mxu1 %v3824_v9  ;;  %v3875_v9 = vld [vmem:[%s4796_s4 + $0x4b8] ss:$24 sps:$4 sm:$0xff]  }
 0x117   : > { %1681 = vmatpush1.bf16.msra.mxu0 %v3724_v33  ;;  %v3841_v33 = vld [vmem:[%s4796_s4 + $0x278] ss:$24 sps:$4 sm:$0xff]  }
 0x118   : > { %1682 = vmatprep.subr.bf16.mxu0 %v3725_v34  ;;  %v3842_v34 = vld [vmem:[%s4796_s4 + $0x2ac] ss:$24 sps:$4 sm:$0xff]  }
 0x119   : > { %1783 = vmatpush1.bf16.msra.mxu1 %v3826_v12  ;;  %v3881_v12 = vld [vmem:[%s4796_s4 + $0x518] ss:$24 sps:$4 sm:$0xff]  }
 0x11a   : > { %1784 = vmatprep.subr.bf16.mxu1 %v3827_v13  ;;  %v3886_v13 = vld [vmem:[%s4796_s4 + $0x54c] ss:$24 sps:$4 sm:$0xff]  }
 0x11b   : > { %1683 = vmatpush1.bf16.msra.mxu0 %v3727_v35  ;;  %v3773_v35 = vld [vmem:[%s4796_s4 + $0x4e0] ss:$24 sps:$4 sm:$0xff]  }
 0x11c   : > { %1684 = vmatprep.subr.bf16.mxu0 %v3728_v36  ;;  %v3778_v36 = vld [vmem:[%s4796_s4 + $0x514] ss:$24 sps:$4 sm:$0xff]  }
 0x11d   : > { %1785 = vmatpush1.bf16.msra.mxu1 %v3829_v16  ;;  %v3887_v16 = vld [vmem:[%s4796_s4 + $0x578] ss:$24 sps:$4 sm:$0xff]  }
 0x11e   : > { %1786 = vmatprep.subr.bf16.mxu1 %v3830_v17  ;;  %v3892_v17 = vld [vmem:[%s4796_s4 + $0x5ac] ss:$24 sps:$4 sm:$0xff]  }
 0x11f   : > { %1685 = vmatpush1.bf16.msra.mxu0 %v3730_v37  ;;  %v3844_v37 = vld [vmem:[%s4796_s4 + $0x2a8] ss:$24 sps:$4 sm:$0xff]  }
 0x120   : > { %1686 = vmatprep.subr.bf16.mxu0 %v3731_v38  ;;  %v3845_v38 = vld [vmem:[%s4796_s4 + $0x2dc] ss:$24 sps:$4 sm:$0xff]  }
 0x121   : > { %1787 = vmatpush1.bf16.msra.mxu1 %v3832_v20  ;;  %v3893_v20 = vld [vmem:[%s4796_s4 + $0x5d8] ss:$24 sps:$4 sm:$0xff]  }
 0x122   : > { %1788 = vmatprep.subr.bf16.mxu1 %v3833_v21  ;;  %v4415_v21 = vmov 0.0  }
 0x123   : > { %1687 = vmatpush1.bf16.msra.mxu0 %v3733_v41  ;;  %v3847_v41 = vld [vmem:[%s4796_s4 + $0x2d8] ss:$24 sps:$4 sm:$0xff]  }
 0x124   : > { %1688 = vmatprep.subr.bf16.mxu0 %v3734_v43  ;;  %v3779_v43 = vld [vmem:[%s4796_s4 + $0x540] ss:$24 sps:$4 sm:$0xff]  }
 0x125   : > { %1789 = vmatpush1.bf16.msra.mxu1 %v3835_v25 }
 0x126   : > { %1790 = vmatprep.subr.bf16.mxu1 %v3836_v26  ;;  %v5010_v26 = vld [vmem:[%s4802_s15] sm:$0x3f] }
 0x127   : > { %1689 = vmatpush1.bf16.msra.mxu0 %v3736_v46  ;;  %v3853_v46 = vld [vmem:[%s4796_s4 + $0x33c] ss:$24 sps:$4 sm:$0xff]  }
 0x128   : > { %1690 = vmatprep.subr.bf16.mxu0 %v3737_v47  ;;  %v3782_v47 = vld [vmem:[%s4796_s4 + $0x570] ss:$24 sps:$4 sm:$0xff]  }
 0x129   : > { %1791 = vmatpush1.bf16.msra.mxu1 %v3838_v29 }
 0x12a   : > { %1792 = vmatprep.subr.bf16.mxu1 %v3839_v30 }
 0x12b   : > { %1691 = vmatpush1.bf16.msra.mxu0 %v3739_v50  ;;  %v3856_v50 = vld [vmem:[%s4796_s4 + $0x36c] ss:$24 sps:$4 sm:$0xff]  }
 0x12c   : > { %1713 = vmatprep.subr.bf16.mxu0 %v3744_v51  ;;  %v3788_v51 = vld [vmem:[%s4796_s4 + $0x5a0] ss:$24 sps:$4 sm:$0xff]  }
 0x12d   : > { %1793 = vmatpush1.bf16.msra.mxu1 %v3841_v33 }
 0x12e   : > { %1693 = vmatmul.mubr.bf16.vlgmr.msra.gmra.mrb[0].mxu0 %v4883_v55  ;;  %1794 = vmatprep.subr.bf16.mxu1 %v3842_v34 }
 0x12f   : > { %1714 = vmatpush1.bf16.msra.mxu0 %v3742_v54  ;;  %1702 = vmatprep.mubr.bf16.mxu0 %v4887_v57  ;;  %v3859_v54 = vld [vmem:[%s4796_s4 + $0x39c] ss:$24 sps:$4 sm:$0xff]  }
 0x130   : > { %1715 = vmatprep.subr.bf16.mxu0 %v3748_v56  ;;  %v3791_v56 = vld [vmem:[%s4796_s4 + $0x5d0] ss:$24 sps:$4 sm:$0xff]  }
 0x131   : > { %1795 = vmatpush1.bf16.msra.mxu1 %v3844_v37 }
 0x132   : > { %1796 = vmatprep.subr.bf16.mxu1 %v3845_v38 }
 0x133   : > { %1716 = vmatpush1.bf16.msra.mxu0 %v3746_v60  ;;  %v3860_v60 = vld [vmem:[%s4796_s4 + $0x3c8] ss:$24 sps:$4 sm:$0xff]  }
 0x134   : > { %1717 = vmatprep.subr.bf16.mxu0 %v3751_v61  ;;  %v3865_v61 = vld [vmem:[%s4796_s4 + $0x3fc] ss:$24 sps:$4 sm:$0xff]  }
 0x135   : > { %1797 = vmatpush1.bf16.msra.mxu1 %v3847_v41 }
 0x136   : > { %1703 = vmatmul.mubr.bf16.gmra.mrb[4].mxu0 %v4899_v1  ;;  %1819 = vmatprep.subr.bf16.mxu1 %v3850_v42 }
 0x137   : > { %1718 = vmatpush1.bf16.msra.mxu0 %v3749_v0  ;;  %1745 = vmatprep.mubr.bf16.mxu0 %v4903_v3  ;;  %v4977_v0 = vld [vmem:[%s4788_s13 + $0x28] ss:$16 sps:$4 sm:$0xff]  }
 0x138   : > { %1719 = vmatprep.subr.bf16.mxu0 %v3754_v2  ;;  %1799 = vmatmul.mubr.bf16.vlgmr.msra.gmra.mrb[0].mxu1 %v4883_v55  ;;  %v3857_v55 = vld [vmem:[%s4796_s4 + $0x398] ss:$24 sps:$4 sm:$0xff]   ;;  %v3866_v2 = vld [vmem:[%s4796_s4 + $0x428] ss:$24 sps:$4 sm:$0xff]  }
 0x139   : > { %1820 = vmatpush1.bf16.msra.mxu1 %v3848_v45  ;;  %1808 = vmatprep.mubr.bf16.mxu1 %v4887_v57  ;;  %v4964_v57 = vld [vmem:[%s4788_s13 + $0x8] ss:$16 sps:$4 sm:$0xff]  }
 0x13a   : > { %1821 = vmatprep.subr.bf16.mxu1 %v3853_v46 }
 0x13b   : > { %1720 = vmatpush1.bf16.msra.mxu0 %v3752_v6  ;;  %v3874_v6 = vld [vmem:[%s4796_s4 + $0x48c] ss:$24 sps:$4 sm:$0xff]  }
 0x13c   : > { %1721 = vmatprep.subr.bf16.mxu0 %v3757_v7  ;;  %v3872_v7 = vld [vmem:[%s4796_s4 + $0x488] ss:$24 sps:$4 sm:$0xff]  }
 0x13d   : > { %1822 = vmatpush1.bf16.msra.mxu1 %v3851_v49 }
 0x13e   : > { %1823 = vmatprep.subr.bf16.mxu1 %v3856_v50 }
 0x13f   : > { %1722 = vmatpush1.bf16.msra.mxu0 %v3755_v10  ;;  %v3880_v10 = vld [vmem:[%s4796_s4 + $0x4ec] ss:$24 sps:$4 sm:$0xff]  }
 0x140   : > { %1723 = vmatprep.subr.bf16.mxu0 %v3760_v11  ;;  %1809 = vmatmul.mubr.bf16.gmra.mrb[4].mxu1 %v4899_v1  ;;  %v3883_v11 = vld [vmem:[%s4796_s4 + $0x51c] ss:$24 sps:$4 sm:$0xff]  }
 0x141   : > { %1824 = vmatpush1.bf16.msra.mxu1 %v3854_v53  ;;  %1851 = vmatprep.mubr.bf16.mxu1 %v4903_v3 }
 0x142   : > { %1825 = vmatprep.subr.bf16.mxu1 %v3859_v54 }
 0x143   : > { %1724 = vmatpush1.bf16.msra.mxu0 %v3758_v14  ;;  %v3884_v14 = vld [vmem:[%s4796_s4 + $0x548] ss:$24 sps:$4 sm:$0xff]  }
 0x144   : > { %1725 = vmatprep.subr.bf16.mxu0 %v3763_v15  ;;  %v3889_v15 = vld [vmem:[%s4796_s4 + $0x57c] ss:$24 sps:$4 sm:$0xff]  }
 0x145   : > { %1826 = vmatpush1.bf16.msra.mxu1 %v3857_v55 }
 0x146   : > { %1827 = vmatprep.subr.bf16.mxu1 %v3862_v58 }
 0x147   : > { %1726 = vmatpush1.bf16.msra.mxu0 %v3761_v18  ;;  %v3890_v18 = vld [vmem:[%s4796_s4 + $0x5a8] ss:$24 sps:$4 sm:$0xff]  }
 0x148   : > { %1727 = vmatprep.subr.bf16.mxu0 %v3766_v19  ;;  %v3895_v19 = vld [vmem:[%s4796_s4 + $0x5dc] ss:$24 sps:$4 sm:$0xff]  }
 0x149   : > { %1828 = vmatpush1.bf16.msra.mxu1 %v3860_v60 }
 0x14a   : > { %1829 = vmatprep.subr.bf16.mxu1 %v3865_v61 }
 0x14b   : > { %1728 = vmatpush1.bf16.msra.mxu0 %v3764_v22  ;;  %v630_v22 = vlaneseq }
 0x14c   : > { %1729 = vmatprep.subr.bf16.mxu0 %v3769_v23 }
 0x14d   : > { %1830 = vmatpush1.bf16.msra.mxu1 %v3863_v62  ;;  %v5006_v23 = vshrl.u32 %v630_v22, 7 }
 0x14e   : > { %1831 = vmatprep.subr.bf16.mxu1 %v3868_v63 }
 0x14f   : > { %1730 = vmatpush1.bf16.msra.mxu0 %v3767_v27  ;;  %v632_v25 = vsub.s32 0, %v5006_v23  ;;  %v636_v27 = vsub.s32 1, %v5006_v23  ;;  %v640_v50 = vsub.s32 2, %v5006_v23 }
 0x150   : > { %1731 = vmatprep.subr.bf16.mxu0 %v3772_v28 }
 0x151   : > { %1832 = vmatpush1.bf16.msra.mxu1 %v3866_v2  ;;  %v633_v28 = vrot.slane %v5010_v26, %v632_v25  ;;  %v637_v30 = vrot.slane %v5010_v26, %v636_v27 }
 0x152   : > { %1833 = vmatprep.subr.bf16.mxu1 %v3871_v4 }
 0x153   : > { %1732 = vmatpush1.bf16.msra.mxu0 %v3770_v31 }
 0x154   : > { %1733 = vmatprep.subr.bf16.mxu0 %v3775_v32 }
 0x155   : > { %1834 = vmatpush1.bf16.msra.mxu1 %v3869_v5 }
 0x156   : > { %1835 = vmatprep.subr.bf16.mxu1 %v3874_v6 }
 0x157   : > { %1734 = vmatpush1.bf16.msra.mxu0 %v3773_v35 }
 0x158   : > { %1735 = vmatprep.subr.bf16.mxu0 %v3778_v36 }
 0x159   : > { %1836 = vmatpush1.bf16.msra.mxu1 %v3872_v7 }
 0x15a   : > { %1837 = vmatprep.subr.bf16.mxu1 %v3877_v8 }
 0x15b   : > { %1736 = vmatpush1.bf16.msra.mxu0 %v3776_v39 }
 0x15c   : > { %1737 = vmatprep.subr.bf16.mxu0 %v3781_v40 }
 0x15d   : > { %1838 = vmatpush1.bf16.msra.mxu1 %v3875_v9 }
 0x15e   : > { %1839 = vmatprep.subr.bf16.mxu1 %v3880_v10 }
 0x15f   : > { %1738 = vmatpush1.bf16.msra.mxu0 %v3779_v43 }
 0x160   : > { %1739 = vmatprep.subr.bf16.mxu0 %v3784_v44 }
 0x163   : > { %1740 = vmatpush1.bf16.msra.mxu0 %v3782_v47 }
 0x164   : > { %1741 = vmatprep.subr.bf16.mxu0 %v3790_v48 }
 0x167   : > { %1742 = vmatpush1.bf16.msra.mxu0 %v3788_v51  ;;  %v644_v51 = vsub.s32 3, %v5006_v23 }
 0x168   : > { %1743 = vmatprep.subr.bf16.mxu0 %v3793_v52  ;;  %v641_v52 = vrot.slane %v5010_v26, %v640_v50  ;;  %v3913_v50 = vld [vmem:[%s4796_s4 + $0x104] ss:$24 sps:$4 sm:$0xff]  }
 0x169   : > { %v645_v53 = vrot.slane %v5010_v26, %v644_v51  ;;  %v3911_v51 = vld [vmem:[%s4796_s4 + $0x100] ss:$24 sps:$4 sm:$0xff]  }
 0x16b   : > { %1744 = vmatpush1.bf16.msra.mxu0 %v3791_v56 }
 0x16e   : > { %1746 = vmatmul.mubr.bf16.vlgmr.msra.gmra.mrb[0].mxu0 %v4964_v57 }
 0x16f   : > { %1755 = vmatprep.mubr.bf16.mxu0 %v4967_v59 }
 0x176   : > { %1756 = vmatmul.mubr.bf16.gmra.mrb[4].mxu0 %v4977_v0 }
 0x177   : > { %1904 = vmatprep.mubr.bf16.mxu0 %v4848_v24  ;;  %v3878_v24 = vld [vmem:[%s4796_s4 + $0x4e8] ss:$24 sps:$4 sm:$0xff]  }
 0x178   : > { %1840 = vmatpush1.bf16.msra.mxu1 %v3878_v24 }
 0x179   : > { %1841 = vmatprep.subr.bf16.mxu1 %v3883_v11 }
 0x17c   : > { %1842 = vmatpush1.bf16.msra.mxu1 %v3881_v12 }
 0x17d   : > { %1843 = vmatprep.subr.bf16.mxu1 %v3886_v13 }
 0x180   : > { %1844 = vmatpush1.bf16.msra.mxu1 %v3884_v14 }
 0x181   : > { %1845 = vmatprep.subr.bf16.mxu1 %v3889_v15 }
 0x184   : > { %1846 = vmatpush1.bf16.msra.mxu1 %v3887_v16 }
 0x185   : > { %1847 = vmatprep.subr.bf16.mxu1 %v3892_v17 }
 0x188   : > { %1848 = vmatpush1.bf16.msra.mxu1 %v3890_v18 }
 0x189   : > { %1849 = vmatprep.subr.bf16.mxu1 %v3895_v19 }
 0x18c   : > { %1850 = vmatpush1.bf16.msra.mxu1 %v3893_v20 }
 0x18d   : > { %3454 = vmatprep.subr.bf16.mxu1 %v4415_v21 }
 0x18f   : > { %1852 = vmatmul.mubr.bf16.vlgmr.msra.gmra.mrb[0].mxu1 %v4964_v57 }
 0x190   : > { %1861 = vmatprep.mubr.bf16.mxu1 %v4967_v59 }
 0x197   : > { %1862 = vmatmul.mubr.bf16.gmra.mrb[4].mxu1 %v4977_v0 }
 0x198   : > { %3456 = vmatprep.mubr.msk.bf16.mxu1 %vm4416_vm0, %v4415_v21 }
 0x241   : > { %v1747_v29 = vpop.f32.mrb[0].mxu0 }
 0x242   : > { %v1749_v31 = vpop.f32.mrb[1].mxu0  ;;  %v3502_v33 = vadd.f32 %v1747_v29, %v633_v28 }
 0x243   : > { %v1751_v32 = vpop.f32.mrb[2].mxu0  ;;  %v3503_v36 = vadd.f32 %v1749_v31, %v637_v30 }
 0x244   : > { %v3504_v34 = vadd.f32 %v1751_v32, %v633_v28  ;;  %v1753_v35 = vpop.f32.mrb[3].mxu0 }
 0x245   : > { %v3505_v37 = vadd.f32 %v1753_v35, %v637_v30  ;;  %v3898_v35 = vld [vmem:[%s4796_s4 + $0x14] ss:$24 sps:$4 sm:$0xff]  }
 0x246   : > { %v1978_v38 = vpack.c.bf16 %v3504_v34, %v3502_v33  ;;  %v3896_v34 = vld [vmem:[%s4796_s4 + $0x10] ss:$24 sps:$4 sm:$0xff]   ;;  %1872 = vmatprep.subr.bf16.mxu0 %v3898_v35  ;;  %v3955_v35 = vld [vmem:[%s4796_s4 + $0x3a4] ss:$24 sps:$4 sm:$0xff]  }
 0x247   : > { %v1980_v39 = vpack.c.bf16 %v3505_v37, %v3503_v36  ;;  %v3901_v36 = vld [vmem:[%s4796_s4 + $0x44] ss:$24 sps:$4 sm:$0xff]   ;;  %1873 = vmatpush1.bf16.msra.mxu0 %v3896_v34  ;;  %v3899_v37 = vld [vmem:[%s4796_s4 + $0x40] ss:$24 sps:$4 sm:$0xff]   ;;  %v3950_v34 = vld [vmem:[%s4796_s4 + $0x370] ss:$24 sps:$4 sm:$0xff]  }
 0x248   : > { %1874 = vmatprep.subr.bf16.mxu0 %v3901_v36  ;;  %v3953_v36 = vld [vmem:[%s4796_s4 + $0x3a0] ss:$24 sps:$4 sm:$0xff]  }
 0x249   : > { %v1757_v40 = vpop.f32.mrb[4].mxu0  ;;  %3455 = vmatpush3.bf16.xpose.msra.mxu1 %v1980_v39  ;;  %v3902_v39 = vld [vmem:[%s4796_s4 + $0x70] ss:$24 sps:$4 sm:$0xff]  }
 0x24a   : > { %v5015_v41 = vadd.f32 %v1757_v40, %v633_v28  ;;  %v1759_v42 = vpop.f32.mrb[5].mxu0  ;;  %3460 = vmatprep.subr.bf16.mxu1 %v4415_v21  ;;  %v3907_v40 = vld [vmem:[%s4796_s4 + $0xa4] ss:$24 sps:$4 sm:$0xff]  }
 0x24b   : > { %v5018_v43 = vadd.f32 %v1759_v42, %v637_v30  ;;  %v1761_v44 = vpop.f32.mrb[6].mxu0  ;;  %1875 = vmatpush1.bf16.msra.mxu0 %v3899_v37  ;;  %v3905_v42 = vld [vmem:[%s4796_s4 + $0xa0] ss:$24 sps:$4 sm:$0xff]  }
 0x24c   : > { %v5020_v45 = vadd.f32 %v1761_v44, %v633_v28  ;;  %v1763_v46 = vpop.f32.mrb[7].mxu0  ;;  %v3910_v44 = vld [vmem:[%s4796_s4 + $0xd4] ss:$24 sps:$4 sm:$0xff]  }
 0x24d   : > { %v5022_v47 = vadd.f32 %v1763_v46, %v637_v30  ;;  %v3908_v46 = vld [vmem:[%s4796_s4 + $0xd0] ss:$24 sps:$4 sm:$0xff]  }
 0x24e   : > { %v1979_v48 = vpack.c.bf16 %v5020_v45, %v5015_v41  ;;  %v3961_v41 = vld [vmem:[%s4796_s4 + $0x404] ss:$24 sps:$4 sm:$0xff]   ;;  %v3959_v45 = vld [vmem:[%s4796_s4 + $0x400] ss:$24 sps:$4 sm:$0xff]  }
 0x24f   : > { %v1981_v49 = vpack.c.bf16 %v5022_v47, %v5018_v43  ;;  %v3956_v43 = vld [vmem:[%s4796_s4 + $0x3d0] ss:$24 sps:$4 sm:$0xff]   ;;  %v3964_v47 = vld [vmem:[%s4796_s4 + $0x434] ss:$24 sps:$4 sm:$0xff]  }
 0x250   : > { %3457 = vmatmul.mubr.bf16.vlgmr.msra.gmra.mrb[8].mxu1 %v1978_v38  ;;  %v3904_v38 = vld [vmem:[%s4796_s4 + $0x74] ss:$24 sps:$4 sm:$0xff]  }
 0x251   : > { %3462 = vmatprep.mubr.msk.bf16.mxu1 %vm4416_vm0, %v4415_v21  ;;  %1876 = vmatprep.subr.bf16.mxu0 %v3904_v38 }
 0x252   : > { %1877 = vmatpush1.bf16.msra.mxu0 %v3902_v39 }
 0x253   : > { %1878 = vmatprep.subr.bf16.mxu0 %v3907_v40 }
 0x256   : > { %1879 = vmatpush1.bf16.msra.mxu0 %v3905_v42 }
 0x257   : > { %1880 = vmatprep.subr.bf16.mxu0 %v3910_v44 }
 0x25a   : > { %1881 = vmatpush1.bf16.msra.mxu0 %v3908_v46  ;;  %v3976_v46 = vld [vmem:[%s4796_s4 + $0x4f4] ss:$24 sps:$4 sm:$0xff]  }
 0x25b   : > { %1882 = vmatprep.subr.bf16.mxu0 %v3913_v50  ;;  %v3974_v50 = vld [vmem:[%s4796_s4 + $0x4f0] ss:$24 sps:$4 sm:$0xff]  }
 0x25e   : > { %1883 = vmatpush1.bf16.msra.mxu0 %v3911_v51  ;;  %v3979_v51 = vld [vmem:[%s4796_s4 + $0x524] ss:$24 sps:$4 sm:$0xff]  }
 0x262   : > { %v1853_v54 = vpop.f32.mrb[0].mxu1 }
 0x263   : > { %v3510_v56 = vadd.f32 %v1853_v54, %v641_v52  ;;  %v1855_v55 = vpop.f32.mrb[1].mxu1  ;;  %v3919_v54 = vld [vmem:[%s4796_s4 + $0x164] ss:$24 sps:$4 sm:$0xff]  }
 0x264   : > { %v5034_v58 = vadd.f32 %v1855_v55, %v645_v53  ;;  %v1857_v60 = vpop.f32.mrb[2].mxu1  ;;  %v3922_v55 = vld [vmem:[%s4796_s4 + $0x194] ss:$24 sps:$4 sm:$0xff]  }
 0x265   : > { %v3512_v61 = vadd.f32 %v1857_v60, %v641_v52  ;;  %v1859_v62 = vpop.f32.mrb[3].mxu1  ;;  %v3920_v60 = vld [vmem:[%s4796_s4 + $0x190] ss:$24 sps:$4 sm:$0xff]  }
 0x266   : > { %v5036_v63 = vadd.f32 %v1859_v62, %v645_v53  ;;  %v3923_v62 = vld [vmem:[%s4796_s4 + $0x1c0] ss:$24 sps:$4 sm:$0xff]  }
 0x267   : > { %v1982_v2 = vpack.c.bf16 %v3512_v61, %v3510_v56  ;;  %v3917_v56 = vld [vmem:[%s4796_s4 + $0x160] ss:$24 sps:$4 sm:$0xff]   ;;  %v3925_v61 = vld [vmem:[%s4796_s4 + $0x1c4] ss:$24 sps:$4 sm:$0xff]  }
 0x268   : > { %v2201_v4 = vpack.c.bf16 %v5036_v63, %v5034_v58 }
 0x269   : > { %3461 = vmatpush3.bf16.msra.mxu1 %v1982_v2  ;;  %v3928_v2 = vld [vmem:[%s4796_s4 + $0x1f4] ss:$24 sps:$4 sm:$0xff]  }
 0x26a   : > { %v1863_v5 = vpop.f32.mrb[4].mxu1  ;;  %3466 = vmatprep.subr.bf16.mxu1 %v4415_v21 }
 0x26b   : > { %v5041_v6 = vadd.f32 %v1863_v5, %v641_v52  ;;  %v1865_v7 = vpop.f32.mrb[5].mxu1  ;;  %v3926_v5 = vld [vmem:[%s4796_s4 + $0x1f0] ss:$24 sps:$4 sm:$0xff]  }
 0x26c   : > { %v5043_v8 = vadd.f32 %v1865_v7, %v645_v53  ;;  %v1867_v9 = vpop.f32.mrb[6].mxu1  ;;  %v3931_v7 = vld [vmem:[%s4796_s4 + $0x224] ss:$24 sps:$4 sm:$0xff]  }
 0x26d   : > { %v5045_v10 = vadd.f32 %v1867_v9, %v641_v52  ;;  %v1869_v24 = vpop.f32.mrb[7].mxu1  ;;  %v3916_v52 = vld [vmem:[%s4796_s4 + $0x134] ss:$24 sps:$4 sm:$0xff]   ;;  %v3929_v9 = vld [vmem:[%s4796_s4 + $0x220] ss:$24 sps:$4 sm:$0xff]  }
 0x26e   : > { %v5047_v11 = vadd.f32 %v1869_v24, %v645_v53  ;;  %v3914_v53 = vld [vmem:[%s4796_s4 + $0x130] ss:$24 sps:$4 sm:$0xff]   ;;  %1884 = vmatprep.subr.bf16.mxu0 %v3916_v52  ;;  %v3934_v24 = vld [vmem:[%s4796_s4 + $0x254] ss:$24 sps:$4 sm:$0xff]   ;;  %v3977_v52 = vld [vmem:[%s4796_s4 + $0x520] ss:$24 sps:$4 sm:$0xff]  }
 0x26f   : > { %v1983_v12 = vpack.c.bf16 %v5045_v10, %v5041_v6  ;;  %1885 = vmatpush1.bf16.msra.mxu0 %v3914_v53  ;;  %v3965_v6 = vld [vmem:[%s4796_s4 + $0x460] ss:$24 sps:$4 sm:$0xff]   ;;  %v3970_v10 = vld [vmem:[%s4796_s4 + $0x494] ss:$24 sps:$4 sm:$0xff]  }
 0x270   : > { %v2202_v13 = vpack.c.bf16 %v5047_v11, %v5043_v8  ;;  %1886 = vmatprep.subr.bf16.mxu0 %v3919_v54  ;;  %v3982_v53 = vld [vmem:[%s4796_s4 + $0x554] ss:$24 sps:$4 sm:$0xff]   ;;  %v3980_v54 = vld [vmem:[%s4796_s4 + $0x550] ss:$24 sps:$4 sm:$0xff]  }
 0x273   : > { %1887 = vmatpush1.bf16.msra.mxu0 %v3917_v56  ;;  %v3985_v56 = vld [vmem:[%s4796_s4 + $0x584] ss:$24 sps:$4 sm:$0xff]  }
 0x274   : > { %1888 = vmatprep.subr.bf16.mxu0 %v3922_v55  ;;  %v3983_v55 = vld [vmem:[%s4796_s4 + $0x580] ss:$24 sps:$4 sm:$0xff]  }
 0x277   : > { %1889 = vmatpush1.bf16.msra.mxu0 %v3920_v60  ;;  %v3988_v60 = vld [vmem:[%s4796_s4 + $0x5b4] ss:$24 sps:$4 sm:$0xff]  }
 0x278   : > { %1890 = vmatprep.subr.bf16.mxu0 %v3925_v61  ;;  %v3986_v61 = vld [vmem:[%s4796_s4 + $0x5b0] ss:$24 sps:$4 sm:$0xff]  }
 0x27b   : > { %1891 = vmatpush1.bf16.msra.mxu0 %v3923_v62  ;;  %v3991_v62 = vld [vmem:[%s4796_s4 + $0x5e4] ss:$24 sps:$4 sm:$0xff]  }
 0x27c   : > { %1892 = vmatprep.subr.bf16.mxu0 %v3928_v2  ;;  %v3989_v2 = vld [vmem:[%s4796_s4 + $0x5e0] ss:$24 sps:$4 sm:$0xff]  }
 0x27f   : > { %1893 = vmatpush1.bf16.msra.mxu0 %v3926_v5 }
 0x280   : > { %1894 = vmatprep.subr.bf16.mxu0 %v3931_v7 }
 0x283   : > { %1895 = vmatpush1.bf16.msra.mxu0 %v3929_v9 }
 0x284   : > { %1896 = vmatprep.subr.bf16.mxu0 %v3934_v24 }
 0x323   : > { %v2018_v14 = vpop.f32.mrb[8].mxu1 }
 0x324   : > { %v3458_v15 = vpop.f32.mrb[9].mxu1  ;;  %v2026_v16 = vsel %vm2025_vm1, %v2018_v14, -inf }
 0x325   : > { %2027 = vmax.xlane.f32.xlu0 %v2026_v16  ;;  %v2021_v17 = vpop.f32.mrb[10].mxu1  ;;  %v3937_v15 = vld [vmem:[%s4796_s4 + $0x284] ss:$24 sps:$4 sm:$0xff]   ;;  %v3935_v16 = vld [vmem:[%s4796_s4 + $0x280] ss:$24 sps:$4 sm:$0xff]  }
 0x326   : > { %v3459_v18 = vpop.f32.mrb[11].mxu1  ;;  %v2029_v19 = vsel %vm2025_vm1, %v2021_v17, -inf }
 0x327   : > { %v3938_v18 = vld [vmem:[%s4796_s4 + $0x2b0] ss:$24 sps:$4 sm:$0xff]  }
 0x329   : > { %2030 = vmax.xlane.f32.xlu0 %v2029_v19  ;;  %v3943_v19 = vld [vmem:[%s4796_s4 + $0x2e4] ss:$24 sps:$4 sm:$0xff]  }
 0x3b2   : > { %v2028_v20 = vpop.xlane.xlu0 %2027 }
 0x3b3   : > { %v2032_v22 = vsub.f32 %v2018_v14, %v2028_v20  ;;  %v3932_v14 = vld [vmem:[%s4796_s4 + $0x250] ss:$24 sps:$4 sm:$0xff]   ;;  %v3941_v20 = vld [vmem:[%s4796_s4 + $0x2e0] ss:$24 sps:$4 sm:$0xff]  }
 0x3b4   : > { %1897 = vmatpush1.bf16.msra.mxu0 %v3932_v14 }
 0x3b5   : > { %v2034_v25 = vmul.f32 1.442695, %v2032_v22  ;;  %1898 = vmatprep.subr.bf16.mxu0 %v3937_v15  ;;  %v3946_v22 = vld [vmem:[%s4796_s4 + $0x314] ss:$24 sps:$4 sm:$0xff]  }
 0x3b6   : > { %v2031_v27 = vpop.xlane.xlu0 %2030 }
 0x3b7   : > { %4088 = vpow2.f32 %v2034_v25  ;;  %v2033_v28 = vsub.f32 %v2021_v17, %v2031_v27  ;;  %v3940_v17 = vld [vmem:[%s4796_s4 + $0x2b4] ss:$24 sps:$4 sm:$0xff]   ;;  %v3944_v25 = vld [vmem:[%s4796_s4 + $0x310] ss:$24 sps:$4 sm:$0xff]   ;;  %v3949_v27 = vld [vmem:[%s4796_s4 + $0x344] ss:$24 sps:$4 sm:$0xff]  }
 0x3b8   : > { %1899 = vmatpush1.bf16.msra.mxu0 %v3935_v16 }
 0x3b9   : > { %v2036_v29 = vmul.f32 1.442695, %v2033_v28  ;;  %1900 = vmatprep.subr.bf16.mxu0 %v3940_v17  ;;  %v4120_v28 = vld [vmem:[%s4788_s13] ss:$16 sps:$4 sm:$0xff]  }
 0x3bb   : > { %4090 = vpow2.f32 %v2036_v29  ;;  %v3947_v29 = vld [vmem:[%s4796_s4 + $0x340] ss:$24 sps:$4 sm:$0xff]  }
 0x3bc   : > { %1901 = vmatpush1.bf16.msra.mxu0 %v3938_v18 }
 0x3bd   : > { %1902 = vmatprep.subr.bf16.mxu0 %v3943_v19 }
 0x3c0   : > { %1903 = vmatpush1.bf16.msra.mxu0 %v3941_v20 }
 0x3c1   : > { %v5055_v30 = vpop.eup %4088  ;;  %1925 = vmatprep.subr.bf16.mxu0 %v3946_v22 }
 0x3c2   : > { %v2038_v31 = vsel %vm2025_vm1, %v5055_v30, 0.0 }
 0x3c3   : > { %2039 = vadd.xlane.f32.xlu1 %v2038_v31  ;;  %1905 = vmatmul.mubr.bf16.vlgmr.msra.gmra.mrb[8].mxu0 %v4120_v28  ;;  %v4121_v31 = vld [vmem:[%s4788_s13 + $0x24] ss:$16 sps:$4 sm:$0xff]   ;;  %s5464_s13 = smov %s5463_s21 }
 0x3c4   : > { %1926 = vmatpush1.bf16.msra.mxu0 %v3944_v25  ;;  %1914 = vmatprep.mubr.bf16.mxu0 %v4121_v31 }
 0x3c5   : > { %v5059_v32 = vpop.eup %4090  ;;  %1927 = vmatprep.subr.bf16.mxu0 %v3949_v27 }
 0x3c6   : > { %v2041_v33 = vsel %vm2025_vm1, %v5059_v32, 0.0 }
 0x3c7   : > { %2042 = vadd.xlane.f32.xlu1 %v2041_v33  ;;  %v3952_v33 = vld [vmem:[%s4796_s4 + $0x374] ss:$24 sps:$4 sm:$0xff]  }
 0x3c8   : > { %1928 = vmatpush1.bf16.msra.mxu0 %v3947_v29 }
 0x3c9   : > { %1929 = vmatprep.subr.bf16.mxu0 %v3952_v33 }
 0x3cb   : > { %1915 = vmatmul.mubr.bf16.gmra.mrb[12].mxu0 %v4899_v1 }
 0x3cc   : > { %1930 = vmatpush1.bf16.msra.mxu0 %v3950_v34  ;;  %1957 = vmatprep.mubr.bf16.mxu0 %v4903_v3  ;;  %v3958_v3 = vld [vmem:[%s4796_s4 + $0x3d4] ss:$24 sps:$4 sm:$0xff]  }
 0x3cd   : > { %1931 = vmatprep.subr.bf16.mxu0 %v3955_v35 }
 0x3d0   : > { %1932 = vmatpush1.bf16.msra.mxu0 %v3953_v36 }
 0x3d1   : > { %1933 = vmatprep.subr.bf16.mxu0 %v3958_v3 }
 0x3d4   : > { %1934 = vmatpush1.bf16.msra.mxu0 %v3956_v43 }
 0x3d5   : > { %1935 = vmatprep.subr.bf16.mxu0 %v3961_v41 }
 0x3d8   : > { %1936 = vmatpush1.bf16.msra.mxu0 %v3959_v45 }
 0x3d9   : > { %1937 = vmatprep.subr.bf16.mxu0 %v3964_v47 }
 0x450   : > { %v2040_v37 = vpop.xlane.xlu1 %2039 }
 0x451   : > { %4092 = vrcp.f32 %v2040_v37 }
 0x454   : > { %v2043_v38 = vpop.xlane.xlu1 %2042 }
 0x455   : > { %4094 = vrcp.f32 %v2043_v38 }
 0x45b   : > { %v4093_v39 = vpop.eup %4092 }
 0x45c   : > { %v2046_v42 = vmul.f32 %v4093_v39, %v5055_v30  ;;  %v3973_v30 = vld [vmem:[%s4796_s4 + $0x4c4] ss:$24 sps:$4 sm:$0xff]  }
 0x45f   : > { %v4095_v40 = vpop.eup %4094 }
 0x460   : > { %v2047_v1 = vmul.f32 %v4095_v40, %v5059_v32  ;;  %v3971_v32 = vld [vmem:[%s4796_s4 + $0x4c0] ss:$24 sps:$4 sm:$0xff]  }
 0x462   : > { %v2048_v44 = vpack.c.bf16 %v2047_v1, %v2046_v42 }
 0x464   : > { %3463 = vmatmul.mubr.msk.bf16.vlgmr.msra.gmra.mrb[12].mxu1 %vm2025_vm1, %v2048_v44 }
 0x465   : > { %3467 = vmatpush3.bf16.xpose.msra.mxu1 %v1981_v49  ;;  %3468 = vmatprep.mubr.msk.bf16.mxu1 %vm4416_vm0, %v4415_v21  ;;  %v3967_v49 = vld [vmem:[%s4796_s4 + $0x464] ss:$24 sps:$4 sm:$0xff]  }
 0x466   : > { %3472 = vmatprep.subr.bf16.mxu1 %v4415_v21 }
 0x46c   : > { %3469 = vmatmul.mubr.bf16.vlgmr.msra.gmra.mrb[16].mxu1 %v1979_v48  ;;  %v3962_v48 = vld [vmem:[%s4796_s4 + $0x430] ss:$24 sps:$4 sm:$0xff]  }
 0x46d   : > { %3473 = vmatpush3.bf16.msra.mxu1 %v1983_v12  ;;  %3474 = vmatprep.mubr.msk.bf16.mxu1 %vm4416_vm0, %v4415_v21  ;;  %v3968_v12 = vld [vmem:[%s4796_s4 + $0x490] ss:$24 sps:$4 sm:$0xff]   ;;  %s4276_s4 = scalar_lea.vmem %s4275_s11, 4096 }
 0x46e   : > { %3478 = vmatprep.subr.bf16.mxu1 %v4415_v21  ;;  %1938 = vmatpush1.bf16.msra.mxu0 %v3962_v48  ;;  %p4278_p13 = scmp.lt.s32.totalorder %s4276_s4, %s4270_s8 }
 0x46f   : > { %1939 = vmatprep.subr.bf16.mxu0 %v3967_v49 }
 0x470   : > { %p4279_p0 = por %p4278_p13, %p4277_p4 }
 0x472   : > { %1940 = vmatpush1.bf16.msra.mxu0 %v3965_v6  ;;  %p4280_p7 = pnand %p4279_p0, %p4273_p11 }
 0x473   : > { %1941 = vmatprep.subr.bf16.mxu0 %v3970_v10 }
 0x476   : > { %1942 = vmatpush1.bf16.msra.mxu0 %v3968_v12 }
 0x477   : > { %1943 = vmatprep.subr.bf16.mxu0 %v3973_v30 }
 0x47a   : > { %1944 = vmatpush1.bf16.msra.mxu0 %v3971_v32 }
 0x47b   : > { %1945 = vmatprep.subr.bf16.mxu0 %v3976_v46 }
 0x47e   : > { %1946 = vmatpush1.bf16.msra.mxu0 %v3974_v50 }
 0x47f   : > { %1947 = vmatprep.subr.bf16.mxu0 %v3979_v51 }
 0x482   : > { %1948 = vmatpush1.bf16.msra.mxu0 %v3977_v52 }
 0x483   : > { %1949 = vmatprep.subr.bf16.mxu0 %v3982_v53 }
 0x486   : > { %1950 = vmatpush1.bf16.msra.mxu0 %v3980_v54 }
 0x487   : > { %1951 = vmatprep.subr.bf16.mxu0 %v3985_v56 }
 0x48a   : > { %1952 = vmatpush1.bf16.msra.mxu0 %v3983_v55 }
 0x48b   : > { %1953 = vmatprep.subr.bf16.mxu0 %v3988_v60 }
 0x48e   : > { %1954 = vmatpush1.bf16.msra.mxu0 %v3986_v61 }
 0x48f   : > { %1955 = vmatprep.subr.bf16.mxu0 %v3991_v62 }
 0x492   : > { %1956 = vmatpush1.bf16.msra.mxu0 %v3989_v2 }
 0x495   : > { %1958 = vmatmul.mubr.bf16.vlgmr.msra.gmra.mrb[8].mxu0 %v4964_v57  ;;  %v648_v57 = vsub.s32 4, %v5006_v23 }
 0x496   : > { %1967 = vmatprep.mubr.bf16.mxu0 %v4967_v59  ;;  %v652_v59 = vsub.s32 5, %v5006_v23 }
 0x498   : > { %v653_v22 = vrot.slane %v5010_v26, %v652_v59 }
 0x49d   : > { %1968 = vmatmul.mubr.bf16.gmra.mrb[12].mxu0 %v4977_v0  ;;  %v649_v0 = vrot.slane %v5010_v26, %v648_v57 }
 0x537   : > { %v2086_v5 = vpop.f32.mrb[12].mxu1 }
 0x538   : > { %v3464_v7 = vpop.f32.mrb[13].mxu1 }
 0x539   : > { %v2089_v9 = vpop.f32.mrb[14].mxu1 }
 0x53a   : > { %v5152_v24 = vpack.c.bf16 %v2089_v9, %v2086_v5  ;;  %v3465_v14 = vpop.f32.mrb[15].mxu1 }
 0x53f   : > { %v2127_v15 = vpop.f32.mrb[16].mxu1 }
 0x540   : > { %v3470_v16 = vpop.f32.mrb[17].mxu1  ;;  %v2134_v17 = vsel %vm2025_vm1, %v2127_v15, -inf }
 0x541   : > { %2135 = vmax.xlane.f32.xlu0 %v2134_v17  ;;  %v2130_v18 = vpop.f32.mrb[18].mxu1 }
 0x542   : > { %v3471_v19 = vpop.f32.mrb[19].mxu1  ;;  %v2137_v20 = vsel %vm2025_vm1, %v2130_v18, -inf }
 0x543   : > { %2138 = vmax.xlane.f32.xlu1 %v2137_v20 }
 0x568   : > { %v1959_v25 = vpop.f32.mrb[8].mxu0 }
 0x569   : > { %v3518_v27 = vadd.f32 %v1959_v25, %v649_v0  ;;  %v1961_v28 = vpop.f32.mrb[9].mxu0  ;;  %v3994_v25 = vld [vmem:[%s4804_s23 + $0xc] ss:$16 sps:$4 sm:$0xff]  }
 0x56a   : > { %v3519_v29 = vadd.f32 %v1961_v28, %v653_v22  ;;  %v1963_v31 = vpop.f32.mrb[10].mxu0  ;;  %2864 = vmatprep.subr.bf16.mxu0 %v3994_v25  ;;  %v3995_v28 = vld [vmem:[%s4804_s23 + $0x28] ss:$16 sps:$4 sm:$0xff]  }
 0x56b   : > { %v3520_v33 = vadd.f32 %v1963_v31, %v649_v0  ;;  %v1965_v34 = vpop.f32.mrb[11].mxu0  ;;  %v3998_v31 = vld [vmem:[%s4804_s23 + $0x48] ss:$16 sps:$4 sm:$0xff]  }
 0x56c   : > { %v3521_v35 = vadd.f32 %v1965_v34, %v653_v22  ;;  %v4001_v34 = vld [vmem:[%s4804_s23 + $0x68] ss:$16 sps:$4 sm:$0xff]  }
 0x56d   : > { %v2203_v36 = vpack.c.bf16 %v3520_v33, %v3518_v27  ;;  %v3997_v27 = vld [vmem:[%s4804_s23 + $0x2c] ss:$16 sps:$4 sm:$0xff]  }
 0x56e   : > { %v2205_v37 = vpack.c.bf16 %v3521_v35, %v3519_v29  ;;  %v4000_v29 = vld [vmem:[%s4804_s23 + $0x4c] ss:$16 sps:$4 sm:$0xff]  }
 0x56f   : > { %v4003_v33 = vld [vmem:[%s4804_s23 + $0x6c] ss:$16 sps:$4 sm:$0xff]  }
 0x570   : > { %v1969_v41 = vpop.f32.mrb[12].mxu0  ;;  %v4006_v35 = vld [vmem:[%s4804_s23 + $0x8c] ss:$16 sps:$4 sm:$0xff]  }
 0x571   : > { %v1971_v45 = vpop.f32.mrb[13].mxu0  ;;  %v5162_v49 = vadd.f32 %v1969_v41, %v649_v0  ;;  %v4022_v41 = vld [vmem:[%s4804_s23 + $0x148] ss:$16 sps:$4 sm:$0xff]  }
 0x572   : > { %v1973_v47 = vpop.f32.mrb[14].mxu0  ;;  %v5164_v6 = vadd.f32 %v1971_v45, %v653_v22  ;;  %v4027_v45 = vld [vmem:[%s4804_s23 + $0x16c] ss:$16 sps:$4 sm:$0xff]  }
 0x573   : > { %v1975_v48 = vpop.f32.mrb[15].mxu0  ;;  %v5166_v10 = vadd.f32 %v1973_v47, %v649_v0  ;;  %v4025_v47 = vld [vmem:[%s4804_s23 + $0x168] ss:$16 sps:$4 sm:$0xff]  }
 0x574   : > { %v5168_v12 = vadd.f32 %v1975_v48, %v653_v22  ;;  %v3992_v22 = vld [vmem:[%s4804_s23 + $0x8] ss:$16 sps:$4 sm:$0xff]   ;;  %v4030_v48 = vld [vmem:[%s4804_s23 + $0x18c] ss:$16 sps:$4 sm:$0xff]  }
 0x575   : > { %v2204_v30 = vpack.c.bf16 %v5166_v10, %v5162_v49  ;;  %2865 = vmatpush1.bf16.msra.mxu0 %v3992_v22  ;;  %v2920_v22 = vld [vmem:[%s4815_s30 + $0x18] sm:$0xff] }
 0x576   : > { %v2206_v32 = vpack.c.bf16 %v5168_v12, %v5164_v6  ;;  %2866 = vmatprep.subr.bf16.mxu0 %v3997_v27  ;;  %v2923_v27 = vld [vmem:[%s4815_s30 + $0x30] sm:$0xff] }
 0x579   : > { %2867 = vmatpush1.bf16.msra.mxu0 %v3995_v28 }
 0x57a   : > { %2868 = vmatprep.subr.bf16.mxu0 %v4000_v29 }
 0x57d   : > { %2869 = vmatpush1.bf16.msra.mxu0 %v3998_v31  ;;  %v2924_v31 = vld [vmem:[%s4815_s30 + $0x38] sm:$0xff] }
 0x57e   : > { %2870 = vmatprep.subr.bf16.mxu0 %v4003_v33 }
 0x581   : > { %2871 = vmatpush1.bf16.msra.mxu0 %v4001_v34 }
 0x582   : > { %2872 = vmatprep.subr.bf16.mxu0 %v4006_v35 }
 0x5ce   : > { %v2136_v38 = vpop.xlane.xlu0 %2135 }
 0x5cf   : > { %v2140_v39 = vsub.f32 %v2127_v15, %v2136_v38  ;;  %v4007_v38 = vld [vmem:[%s4804_s23 + $0xa8] ss:$16 sps:$4 sm:$0xff]  }
 0x5d0   : > { %v2139_v40 = vpop.xlane.xlu1 %2138 }
 0x5d1   : > { %v2142_v42 = vmul.f32 1.442695, %v2140_v39  ;;  %v2141_v1 = vsub.f32 %v2130_v18, %v2139_v40  ;;  %v4012_v39 = vld [vmem:[%s4804_s23 + $0xcc] ss:$16 sps:$4 sm:$0xff]   ;;  %v4010_v40 = vld [vmem:[%s4804_s23 + $0xc8] ss:$16 sps:$4 sm:$0xff]  }
 0x5d3   : > { %4096 = vpow2.f32 %v2142_v42  ;;  %v2144_v23 = vmul.f32 1.442695, %v2141_v1  ;;  %v4015_v42 = vld [vmem:[%s4804_s23 + $0xec] ss:$16 sps:$4 sm:$0xff]   ;;  %v4013_v1 = vld [vmem:[%s4804_s23 + $0xe8] ss:$16 sps:$4 sm:$0xff]  }
 0x5d5   : > { %4098 = vpow2.f32 %v2144_v23  ;;  %v4018_v23 = vld [vmem:[%s4804_s23 + $0x10c] ss:$16 sps:$4 sm:$0xff]  }
 0x5dd   : > { %v4097_v44 = vpop.eup %4096 }
 0x5de   : > { %v2146_v26 = vsel %vm2025_vm1, %v4097_v44, 0.0 }
 0x5df   : > { %v4099_v3 = vpop.eup %4098  ;;  %2147 = vadd.xlane.f32.xlu0 %v2146_v26  ;;  %v4021_v26 = vld [vmem:[%s4804_s23 + $0x12c] ss:$16 sps:$4 sm:$0xff]  }
 0x5e0   : > { %v2149_v43 = vsel %vm2025_vm1, %v4099_v3, 0.0 }
 0x5e1   : > { %2150 = vadd.xlane.f32.xlu1 %v2149_v43  ;;  %v4024_v43 = vld [vmem:[%s4804_s23 + $0x14c] ss:$16 sps:$4 sm:$0xff]  }
 0x66c   : > { %v2148_v46 = vpop.xlane.xlu0 %2147 }
 0x66d   : > { %4100 = vrcp.f32 %v2148_v46  ;;  %v4028_v46 = vld [vmem:[%s4804_s23 + $0x188] ss:$16 sps:$4 sm:$0xff]  }
 0x66e   : > { %v2151_v50 = vpop.xlane.xlu1 %2150 }
 0x66f   : > { %4102 = vrcp.f32 %v2151_v50  ;;  %v4033_v50 = vld [vmem:[%s4804_s23 + $0x1ac] ss:$16 sps:$4 sm:$0xff]  }
 0x677   : > { %v4101_v51 = vpop.eup %4100 }
 0x678   : > { %v2154_v53 = vmul.f32 %v4101_v51, %v4097_v44  ;;  %v4016_v44 = vld [vmem:[%s4804_s23 + $0x108] ss:$16 sps:$4 sm:$0xff]  }
 0x679   : > { %v4103_v52 = vpop.eup %4102  ;;  %v4031_v51 = vld [vmem:[%s4804_s23 + $0x1a8] ss:$16 sps:$4 sm:$0xff]  }
 0x67a   : > { %v2155_v54 = vmul.f32 %v4103_v52, %v4099_v3  ;;  %v4019_v3 = vld [vmem:[%s4804_s23 + $0x128] ss:$16 sps:$4 sm:$0xff]   ;;  %v4036_v52 = vld [vmem:[%s4804_s23 + $0x1cc] ss:$16 sps:$4 sm:$0xff]  }
 0x67c   : > { %v2156_v56 = vpack.c.bf16 %v2155_v54, %v2154_v53  ;;  %v4034_v53 = vld [vmem:[%s4804_s23 + $0x1c8] ss:$16 sps:$4 sm:$0xff]  }
 0x67e   : > { %3475 = vmatmul.mubr.msk.bf16.vlgmr.msra.gmra.mrb[20].mxu1 %vm2025_vm1, %v2156_v56 }
 0x67f   : > { %3479 = vmatpush3.bf16.xpose.msra.mxu1 %v2203_v36  ;;  %3480 = vmatprep.mubr.msk.bf16.mxu1 %vm4416_vm0, %v4415_v21  ;;  %v4004_v36 = vld [vmem:[%s4804_s23 + $0x88] ss:$16 sps:$4 sm:$0xff]  }
 0x680   : > { %3484 = vmatprep.subr.bf16.mxu1 %v4415_v21  ;;  %2873 = vmatpush1.bf16.msra.mxu0 %v4004_v36 }
 0x686   : > { %3481 = vmatmul.mubr.bf16.vlgmr.msra.gmra.mrb[24].mxu1 %v2201_v4 }
 0x687   : > { %3485 = vmatpush3.bf16.msra.mxu1 %v2205_v37  ;;  %3486 = vmatprep.mubr.msk.bf16.mxu1 %vm4416_vm0, %v4415_v21  ;;  %v4009_v37 = vld [vmem:[%s4804_s23 + $0xac] ss:$16 sps:$4 sm:$0xff]  }
 0x688   : > { %3490 = vmatprep.subr.bf16.mxu1 %v4415_v21  ;;  %2874 = vmatprep.subr.bf16.mxu0 %v4009_v37 }
 0x689   : > { %2875 = vmatpush1.bf16.msra.mxu0 %v4007_v38 }
 0x68a   : > { %2876 = vmatprep.subr.bf16.mxu0 %v4012_v39 }
 0x68d   : > { %2877 = vmatpush1.bf16.msra.mxu0 %v4010_v40 }
 0x68e   : > { %2878 = vmatprep.subr.bf16.mxu0 %v4015_v42 }
 0x691   : > { %2879 = vmatpush1.bf16.msra.mxu0 %v4013_v1 }
 0x692   : > { %2880 = vmatprep.subr.bf16.mxu0 %v4018_v23 }
 0x695   : > { %2881 = vmatpush1.bf16.msra.mxu0 %v4016_v44  ;;  %v4040_v44 = vld [vmem:[%s4804_s23] ss:$16 sps:$4 sm:$0xff]  }
 0x696   : > { %2882 = vmatprep.subr.bf16.mxu0 %v4021_v26 }
 0x699   : > { %2883 = vmatpush1.bf16.msra.mxu0 %v4019_v3  ;;  %v4045_v3 = vld [vmem:[%s4804_s23 + $0x24] ss:$16 sps:$4 sm:$0xff]  }
 0x69a   : > { %2884 = vmatprep.subr.bf16.mxu0 %v4024_v43  ;;  %v4043_v43 = vld [vmem:[%s4804_s23 + $0x20] ss:$16 sps:$4 sm:$0xff]  }
 0x69d   : > { %2885 = vmatpush1.bf16.msra.mxu0 %v4022_v41  ;;  %v4048_v41 = vld [vmem:[%s4804_s23 + $0x44] ss:$16 sps:$4 sm:$0xff]  }
 0x69e   : > { %2886 = vmatprep.subr.bf16.mxu0 %v4027_v45  ;;  %v4046_v45 = vld [vmem:[%s4804_s23 + $0x40] ss:$16 sps:$4 sm:$0xff]  }
 0x6a1   : > { %2887 = vmatpush1.bf16.msra.mxu0 %v4025_v47  ;;  %v4051_v47 = vld [vmem:[%s4804_s23 + $0x64] ss:$16 sps:$4 sm:$0xff]  }
 0x6a2   : > { %2888 = vmatprep.subr.bf16.mxu0 %v4030_v48  ;;  %v4049_v48 = vld [vmem:[%s4804_s23 + $0x60] ss:$16 sps:$4 sm:$0xff]  }
 0x6a5   : > { %2889 = vmatpush1.bf16.msra.mxu0 %v4028_v46  ;;  %v4054_v46 = vld [vmem:[%s4804_s23 + $0x84] ss:$16 sps:$4 sm:$0xff]  }
 0x6a6   : > { %2890 = vmatprep.subr.bf16.mxu0 %v4033_v50  ;;  %v4052_v50 = vld [vmem:[%s4804_s23 + $0x80] ss:$16 sps:$4 sm:$0xff]  }
 0x6a9   : > { %2891 = vmatpush1.bf16.msra.mxu0 %v4031_v51  ;;  %v4057_v51 = vld [vmem:[%s4804_s23 + $0xa4] ss:$16 sps:$4 sm:$0xff]  }
 0x6aa   : > { %2892 = vmatprep.subr.bf16.mxu0 %v4036_v52  ;;  %v4055_v52 = vld [vmem:[%s4804_s23 + $0xa0] ss:$16 sps:$4 sm:$0xff]  }
 0x6ad   : > { %2893 = vmatpush1.bf16.msra.mxu0 %v4034_v53  ;;  %v4060_v53 = vld [vmem:[%s4804_s23 + $0xc4] ss:$16 sps:$4 sm:$0xff]  }
 0x751   : > { %v2194_v55 = vpop.f32.mrb[20].mxu1 }
 0x752   : > { %v3476_v60 = vpop.f32.mrb[21].mxu1 }
 0x753   : > { %v2197_v61 = vpop.f32.mrb[22].mxu1 }
 0x754   : > { %v5184_v62 = vpack.c.bf16 %v2197_v61, %v2194_v55  ;;  %v3477_v2 = vpop.f32.mrb[23].mxu1 }
 0x759   : > { %v2241_v5 = vpop.f32.mrb[24].mxu1 }
 0x75a   : > { %v3482_v7 = vpop.f32.mrb[25].mxu1  ;;  %v2248_v9 = vsel %vm2025_vm1, %v2241_v5, -inf }
 0x75b   : > { %2249 = vmax.xlane.f32.xlu0 %v2248_v9  ;;  %v2244_v14 = vpop.f32.mrb[26].mxu1  ;;  %v4039_v7 = vld [vmem:[%s4804_s23 + $0x1ec] ss:$16 sps:$4 sm:$0xff]   ;;  %v4037_v9 = vld [vmem:[%s4804_s23 + $0x1e8] ss:$16 sps:$4 sm:$0xff]  }
 0x75c   : > { %v3483_v58 = vpop.f32.mrb[27].mxu1  ;;  %v2251_v63 = vsel %vm2025_vm1, %v2244_v14, -inf  ;;  %2894 = vmatprep.subr.bf16.mxu0 %v4039_v7  ;;  %v4072_v7 = vld [vmem:[%s4804_s23 + $0x144] ss:$16 sps:$4 sm:$0xff]  }
 0x75d   : > { %2252 = vmax.xlane.f32.xlu1 %v2251_v63  ;;  %2895 = vmatpush1.bf16.msra.mxu0 %v4037_v9  ;;  %v4070_v9 = vld [vmem:[%s4804_s23 + $0x140] ss:$16 sps:$4 sm:$0xff]  }
 0x7e8   : > { %v2250_v4 = vpop.xlane.xlu0 %2249 }
 0x7e9   : > { %v2254_v15 = vsub.f32 %v2241_v5, %v2250_v4 }
 0x7ea   : > { %v2253_v16 = vpop.xlane.xlu1 %2252 }
 0x7eb   : > { %v2256_v17 = vmul.f32 1.442695, %v2254_v15  ;;  %v2255_v18 = vsub.f32 %v2244_v14, %v2253_v16 }
 0x7ed   : > { %4104 = vpow2.f32 %v2256_v17  ;;  %v2258_v19 = vmul.f32 1.442695, %v2255_v18 }
 0x7ef   : > { %4106 = vpow2.f32 %v2258_v19 }
 0x7f7   : > { %v5188_v20 = vpop.eup %4104 }
 0x7f8   : > { %v2260_v57 = vsel %vm2025_vm1, %v5188_v20, 0.0 }
 0x7f9   : > { %v5192_v59 = vpop.eup %4106  ;;  %2261 = vadd.xlane.f32.xlu0 %v2260_v57 }
 0x7fa   : > { %v2263_v0 = vsel %vm2025_vm1, %v5192_v59, 0.0 }
 0x7fb   : > { %2264 = vadd.xlane.f32.xlu1 %v2263_v0  ;;  %v2919_v0 = vld [vmem:[%s4815_s30 + $0x10] sm:$0xff] }
 0x886   : > { %v2262_v54 = vpop.xlane.xlu0 %2261 }
 0x887   : > { %4108 = vrcp.f32 %v2262_v54  ;;  %v4058_v54 = vld [vmem:[%s4804_s23 + $0xc0] ss:$16 sps:$4 sm:$0xff]  }
 0x888   : > { %v2265_v56 = vpop.xlane.xlu1 %2264 }
 0x889   : > { %4110 = vrcp.f32 %v2265_v56  ;;  %v4063_v56 = vld [vmem:[%s4804_s23 + $0xe4] ss:$16 sps:$4 sm:$0xff]  }
 0x891   : > { %v4109_v55 = vpop.eup %4108 }
 0x892   : > { %v2268_v61 = vmul.f32 %v4109_v55, %v5188_v20  ;;  %v4061_v55 = vld [vmem:[%s4804_s23 + $0xe0] ss:$16 sps:$4 sm:$0xff]  }
 0x893   : > { %v4111_v60 = vpop.eup %4110 }
 0x894   : > { %v2269_v2 = vmul.f32 %v4111_v60, %v5192_v59  ;;  %v4042_v59 = vld [vmem:[%s4804_s23 + $0x4] ss:$16 sps:$4 sm:$0xff]  }
 0x895   : > { %v4066_v60 = vld [vmem:[%s4804_s23 + $0x104] ss:$16 sps:$4 sm:$0xff]  }
 0x896   : > { %v2270_v5 = vpack.c.bf16 %v2269_v2, %v2268_v61  ;;  %v4064_v61 = vld [vmem:[%s4804_s23 + $0x100] ss:$16 sps:$4 sm:$0xff]   ;;  %v4069_v2 = vld [vmem:[%s4804_s23 + $0x124] ss:$16 sps:$4 sm:$0xff]  }
 0x898   : > { %3487 = vmatmul.mubr.msk.bf16.vlgmr.msra.gmra.mrb[28].mxu1 %vm2025_vm1, %v2270_v5  ;;  %v4067_v5 = vld [vmem:[%s4804_s23 + $0x120] ss:$16 sps:$4 sm:$0xff]  }
 0x899   : > { %3491 = vmatpush3.bf16.xpose.msra.mxu1 %v2204_v30  ;;  %3492 = vmatprep.mubr.msk.bf16.mxu1 %vm4416_vm0, %v4415_v21 }
 0x89a   : > { %3496 = vmatprep.subr.bf16.mxu1 %v4415_v21 }
 0x8a0   : > { %3493 = vmatmul.mubr.bf16.vlgmr.msra.gmra.mrb[32].mxu1 %v2202_v13 }
 0x8a1   : > { %3497 = vmatpush3.bf16.msra.mxu1 %v2206_v32  ;;  %3498 = vmatprep.mubr.msk.bf16.mxu1 %vm4416_vm0, %v4415_v21 }
 0x8a2   : > { %2811 = vmatprep.subr.bf16.mxu1 %v4042_v59 }
 0x96b   : > { %v2308_v49 = vpop.f32.mrb[28].mxu1 }
 0x96c   : > { %v3488_v10 = vpop.f32.mrb[29].mxu1 }
 0x96d   : > { %v2311_v30 = vpop.f32.mrb[30].mxu1  ;;  %v4073_v10 = vld [vmem:[%s4804_s23 + $0x160] ss:$16 sps:$4 sm:$0xff]  }
 0x96e   : > { %v2424_v14 = vpack.c.bf16 %v2311_v30, %v2308_v49  ;;  %v3489_v58 = vpop.f32.mrb[31].mxu1  ;;  %v4075_v49 = vld [vmem:[%s4804_s23 + $0x164] ss:$16 sps:$4 sm:$0xff]  }
 0x96f   : > { %v4078_v30 = vld [vmem:[%s4804_s23 + $0x184] ss:$16 sps:$4 sm:$0xff]  }
 0x970   : > { %2896 = vmatprep.mubr.bf16.mxu0 %v2424_v14  ;;  %v4081_v58 = vld [vmem:[%s4804_s23 + $0x1a4] ss:$16 sps:$4 sm:$0xff]  }
 0x971   : > { %2897 = vmatmul.mubr.bf16.vlgmr.msra.gmra.mrb[16].mxu0 %v5152_v24 }
 0x973   : > { %v2349_v8 = vpop.f32.mrb[32].mxu1 }
 0x974   : > { %v3494_v11 = vpop.f32.mrb[33].mxu1  ;;  %v2356_v13 = vsel %vm2025_vm1, %v2349_v8, -inf }
 0x975   : > { %2357 = vmax.xlane.f32.xlu0 %v2356_v13  ;;  %v2352_v6 = vpop.f32.mrb[34].mxu1  ;;  %v4084_v11 = vld [vmem:[%s4804_s23 + $0x1c4] ss:$16 sps:$4 sm:$0xff]   ;;  %v4082_v13 = vld [vmem:[%s4804_s23 + $0x1c0] ss:$16 sps:$4 sm:$0xff]  }
 0x976   : > { %v3495_v12 = vpop.f32.mrb[35].mxu1  ;;  %v2359_v21 = vsel %vm2025_vm1, %v2352_v6, -inf }
 0x977   : > { %2360 = vmax.xlane.f32.xlu1 %v2359_v21  ;;  %v4085_v12 = vld [vmem:[%s4804_s23 + $0x1e0] ss:$16 sps:$4 sm:$0xff]  }
 0xa02   : > { %v2358_v32 = vpop.xlane.xlu0 %2357 }
 0xa03   : > { %v2362_v63 = vsub.f32 %v2349_v8, %v2358_v32  ;;  %v4079_v8 = vld [vmem:[%s4804_s23 + $0x1a0] ss:$16 sps:$4 sm:$0xff]  }
 0xa04   : > { %v2361_v4 = vpop.xlane.xlu1 %2360 }
 0xa05   : > { %v2364_v15 = vmul.f32 1.442695, %v2362_v63  ;;  %v2363_v16 = vsub.f32 %v2352_v6, %v2361_v4  ;;  %v4087_v6 = vld [vmem:[%s4804_s23 + $0x1e4] ss:$16 sps:$4 sm:$0xff]  }
 0xa07   : > { %4112 = vpow2.f32 %v2364_v15  ;;  %v2366_v17 = vmul.f32 1.442695, %v2363_v16  ;;  %v2917_v16 = vld [vmem:[%s4815_s30] sm:$0xff] }
 0xa09   : > { %4114 = vpow2.f32 %v2366_v17  ;;  %v2918_v17 = vld [vmem:[%s4815_s30 + $0x8] sm:$0xff] }
 0xa11   : > { %v4113_v18 = vpop.eup %4112 }
 0xa12   : > { %v2368_v19 = vsel %vm2025_vm1, %v4113_v18, 0.0 }
 0xa13   : > { %v4115_v20 = vpop.eup %4114  ;;  %2369 = vadd.xlane.f32.xlu0 %v2368_v19 }
 0xa14   : > { %v2371_v57 = vsel %vm2025_vm1, %v4115_v20, 0.0 }
 0xa15   : > { %2372 = vadd.xlane.f32.xlu1 %v2371_v57  ;;  %v2922_v57 = vld [vmem:[%s4815_s30 + $0x28] sm:$0xff] }
 0xa44   : > { %v2898_v25 = vpop.f32.mrb[16].mxu0 }
 0xa45   : > { %v2935_v28 = vadd.f32 %v2919_v0, %v2898_v25  ;;  %v2900_v29 = vpop.f32.mrb[17].mxu0 }
 0xa46   : > { %v2936_v33 = vadd.f32 %v2920_v22, %v2900_v29  ;;  %v2902_v34 = vpop.f32.mrb[18].mxu0  ;;  %v2926_v29 = vld [vmem:[%s4815_s30 + $0x48] sm:$0xff] }
 0xa47   : > { %2951 = vst [vmem:[%s4815_s30 + $0x10] sm:$0xff] %v2935_v28  ;;  %v2939_v35 = vadd.f32 %v2923_v27, %v2902_v34  ;;  %v2904_v36 = vpop.f32.mrb[19].mxu0  ;;  %v2925_v27 = vld [vmem:[%s4815_s30 + $0x40] sm:$0xff]  ;;  %v2927_v28 = vld [vmem:[%s4815_s30 + $0x50] sm:$0xff] }
 0xa48   : > { %2952 = vst [vmem:[%s4815_s30 + $0x18] sm:$0xff] %v2936_v33  ;;  %v2940_v37 = vadd.f32 %v2924_v31, %v2904_v36  ;;  %v2928_v31 = vld [vmem:[%s4815_s30 + $0x58] sm:$0xff]  ;;  %v2931_v36 = vld [vmem:[%s4815_s30 + $0x70] sm:$0xff] }
 0xa49   : > { %2955 = vst [vmem:[%s4815_s30 + $0x30] sm:$0xff] %v2939_v35  ;;  %v2929_v35 = vld [vmem:[%s4815_s30 + $0x60] sm:$0xff] }
 0xa4a   : > { %2956 = vst [vmem:[%s4815_s30 + $0x38] sm:$0xff] %v2940_v37 }
 0xaa0   : > { %v2370_v38 = vpop.xlane.xlu0 %2369 }
 0xaa1   : > { %4116 = vrcp.f32 %v2370_v38 }
 0xaa2   : > { %v2373_v39 = vpop.xlane.xlu1 %2372 }
 0xaa3   : > { %4118 = vrcp.f32 %v2373_v39 }
 0xaab   : > { %v4117_v40 = vpop.eup %4116 }
 0xaac   : > { %v2376_v1 = vmul.f32 %v4117_v40, %v4113_v18  ;;  %v2921_v18 = vld [vmem:[%s4815_s30 + $0x20] sm:$0xff] }
 0xaad   : > { %v4119_v42 = vpop.eup %4118 }
 0xaae   : > { %v2377_v23 = vmul.f32 %v4119_v42, %v4115_v20  ;;  %v2930_v42 = vld [vmem:[%s4815_s30 + $0x68] sm:$0xff] }
 0xab0   : > { %v2378_v26 = vpack.c.bf16 %v2377_v23, %v2376_v1  ;;  %v2932_v1 = vld [vmem:[%s4815_s30 + $0x78] sm:$0xff] }
 0xab2   : > { %3499 = vmatmul.mubr.msk.bf16.vlgmr.msra.gmra.mrb[36].mxu1 %vm2025_vm1, %v2378_v26 }
 0xab3   : > { %2812 = vmatpush1.bf16.msra.mxu1 %v4040_v44  ;;  %2843 = vmatprep.mubr.bf16.mxu1 %v2424_v14  ;;  %v4076_v14 = vld [vmem:[%s4804_s23 + $0x180] ss:$16 sps:$4 sm:$0xff]  }
 0xab4   : > { %2813 = vmatprep.subr.bf16.mxu1 %v4045_v3 }
 0xab7   : > { %2814 = vmatpush1.bf16.msra.mxu1 %v4043_v43 }
 0xab8   : > { %2815 = vmatprep.subr.bf16.mxu1 %v4048_v41 }
 0xabb   : > { %2816 = vmatpush1.bf16.msra.mxu1 %v4046_v45 }
 0xabc   : > { %2817 = vmatprep.subr.bf16.mxu1 %v4051_v47 }
 0xabf   : > { %2818 = vmatpush1.bf16.msra.mxu1 %v4049_v48 }
 0xac0   : > { %2819 = vmatprep.subr.bf16.mxu1 %v4054_v46 }
 0xac3   : > { %2820 = vmatpush1.bf16.msra.mxu1 %v4052_v50 }
 0xac4   : > { %2821 = vmatprep.subr.bf16.mxu1 %v4057_v51 }
 0xac7   : > { %2822 = vmatpush1.bf16.msra.mxu1 %v4055_v52 }
 0xac8   : > { %2823 = vmatprep.subr.bf16.mxu1 %v4060_v53 }
 0xacb   : > { %2824 = vmatpush1.bf16.msra.mxu1 %v4058_v54 }
 0xacc   : > { %2825 = vmatprep.subr.bf16.mxu1 %v4063_v56 }
 0xacf   : > { %2826 = vmatpush1.bf16.msra.mxu1 %v4061_v55 }
 0xad0   : > { %2827 = vmatprep.subr.bf16.mxu1 %v4066_v60 }
 0xad3   : > { %2828 = vmatpush1.bf16.msra.mxu1 %v4064_v61 }
 0xad4   : > { %2829 = vmatprep.subr.bf16.mxu1 %v4069_v2 }
 0xad7   : > { %2830 = vmatpush1.bf16.msra.mxu1 %v4067_v5 }
 0xad8   : > { %2831 = vmatprep.subr.bf16.mxu1 %v4072_v7 }
 0xadb   : > { %2832 = vmatpush1.bf16.msra.mxu1 %v4070_v9 }
 0xadc   : > { %2833 = vmatprep.subr.bf16.mxu1 %v4075_v49 }
 0xadf   : > { %2834 = vmatpush1.bf16.msra.mxu1 %v4073_v10 }
 0xae0   : > { %2835 = vmatprep.subr.bf16.mxu1 %v4078_v30 }
 0xae3   : > { %2836 = vmatpush1.bf16.msra.mxu1 %v4076_v14 }
 0xae4   : > { %2837 = vmatprep.subr.bf16.mxu1 %v4081_v58 }
 0xae7   : > { %2838 = vmatpush1.bf16.msra.mxu1 %v4079_v8 }
 0xae8   : > { %2839 = vmatprep.subr.bf16.mxu1 %v4084_v11 }
 0xaeb   : > { %2840 = vmatpush1.bf16.msra.mxu1 %v4082_v13 }
 0xaec   : > { %2841 = vmatprep.subr.bf16.mxu1 %v4087_v6 }
 0xaef   : > { %2842 = vmatpush1.bf16.msra.mxu1 %v4085_v12 }
 0xaf2   : > { %2844 = vmatmul.mubr.bf16.vlgmr.msra.gmra.mrb[40].mxu1 %v5152_v24 }
 0xb85   : > { %v2416_v21 = vpop.f32.mrb[36].mxu1 }
 0xb86   : > { %v3500_v32 = vpop.f32.mrb[37].mxu1 }
 0xb87   : > { %v2419_v63 = vpop.f32.mrb[38].mxu1 }
 0xb88   : > { %v2426_v4 = vpack.c.bf16 %v2419_v63, %v2416_v21  ;;  %v3501_v15 = vpop.f32.mrb[39].mxu1 }
 0xb8a   : > { %2853 = vmatprep.mubr.bf16.mxu1 %v2426_v4  ;;  %2906 = vmatprep.mubr.bf16.mxu0 %v2426_v4 }
 0xb8b   : > { %2854 = vmatmul.mubr.bf16.gmra.mrb[44].mxu1 %v5184_v62  ;;  %2907 = vmatmul.mubr.bf16.gmra.mrb[20].mxu0 %v5184_v62 }
 0xbc5   : > { %v2845_v24 = vpop.f32.mrb[40].mxu1 }
 0xbc6   : > { %v2933_v19 = vadd.f32 %v2917_v16, %v2845_v24  ;;  %v2847_v20 = vpop.f32.mrb[41].mxu1 }
 0xbc7   : > { %v2934_v59 = vadd.f32 %v2918_v17, %v2847_v20  ;;  %v2849_v0 = vpop.f32.mrb[42].mxu1 }
 0xbc8   : > { %2949 = vst [vmem:[%s4815_s30] sm:$0xff] %v2933_v19  ;;  %v2937_v62 = vadd.f32 %v2921_v18, %v2849_v0  ;;  %v2851_v22 = vpop.f32.mrb[43].mxu1 }
 0xbc9   : > { %2950 = vst [vmem:[%s4815_s30 + $0x8] sm:$0xff] %v2934_v59  ;;  %v2938_v25 = vadd.f32 %v2922_v57, %v2851_v22 }
 0xbca   : > { %2953 = vst [vmem:[%s4815_s30 + $0x20] sm:$0xff] %v2937_v62 }
 0xbcb   : > { %2954 = vst [vmem:[%s4815_s30 + $0x28] sm:$0xff] %v2938_v25 }
 0xc5e   : > { %v2855_v33 = vpop.f32.mrb[44].mxu1  ;;  %v2908_v34 = vpop.f32.mrb[20].mxu0 }
 0xc5f   : > { %v2941_v37 = vadd.f32 %v2925_v27, %v2855_v33  ;;  %v2943_v38 = vadd.f32 %v2927_v28, %v2908_v34  ;;  %v2857_v39 = vpop.f32.mrb[45].mxu1  ;;  %v2910_v40 = vpop.f32.mrb[21].mxu0 }
 0xc60   : > { %v2942_v23 = vadd.f32 %v2926_v29, %v2857_v39  ;;  %v2944_v44 = vadd.f32 %v2928_v31, %v2910_v40  ;;  %v2859_v26 = vpop.f32.mrb[46].mxu1  ;;  %v2912_v3 = vpop.f32.mrb[22].mxu0 }
 0xc61   : > { %2957 = vst [vmem:[%s4815_s30 + $0x40] sm:$0xff] %v2941_v37  ;;  %2959 = vst [vmem:[%s4815_s30 + $0x50] sm:$0xff] %v2943_v38  ;;  %v2945_v43 = vadd.f32 %v2929_v35, %v2859_v26  ;;  %v2947_v41 = vadd.f32 %v2931_v36, %v2912_v3  ;;  %v2861_v45 = vpop.f32.mrb[47].mxu1  ;;  %v2914_v47 = vpop.f32.mrb[23].mxu0 }
 0xc62   : > { %2958 = vst [vmem:[%s4815_s30 + $0x48] sm:$0xff] %v2942_v23  ;;  %2960 = vst [vmem:[%s4815_s30 + $0x58] sm:$0xff] %v2944_v44  ;;  %v2946_v48 = vadd.f32 %v2930_v42, %v2861_v45  ;;  %v2948_v46 = vadd.f32 %v2932_v1, %v2914_v47 }
 0xc63   : > { %2961 = vst [vmem:[%s4815_s30 + $0x60] sm:$0xff] %v2945_v43  ;;  %2963 = vst [vmem:[%s4815_s30 + $0x70] sm:$0xff] %v2947_v41 }
 0xc64   : > { %2962 = vst [vmem:[%s4815_s30 + $0x68] sm:$0xff] %v2946_v48  ;;  %2964 = vst [vmem:[%s4815_s30 + $0x78] sm:$0xff] %v2948_v46 }
 0xc65   : > { %4283 = shalt.err (!%p4280_p7)
}
 0xc66   : > { %s4284_s12 = scalar_lea.hbm %s5317_s25, 2048  ;;  %s4288_s9 = scalar_lea.hbm %s5464_s13, 4096 }
 0xc67   : > { %p4285_p6 = scmp.ne.s32.totalorder %s5317_s25, %s4284_s12  ;;  %p4289_p8 = scmp.lt.u32.totalorder %s5317_s25, %s5464_s13 }
 0xc68   : > { %p4290_p9 = scmp.lt.u32.totalorder %s4288_s9, %s4284_s12  ;;  %p4292_p2 = scmp.lt.u32.totalorder %s4284_s12, %s5317_s25 }
 0xc69   : > { %p4286_p5 = pnand %p4285_p6, %p5465_p1 }
 0xc6a   : > { %p4291_p10 = por %p4290_p9, %p4289_p8 }
 0xc6b   : > { %p4287_p12 = pneg %p4286_p5 }
 0xc6c   : > { %p4293_p3 = por %p4292_p2, %p4291_p10 }
 0xc6e   : > { %p4294_p11 = pnand %p4293_p3, %p4287_p12 }
 0xc70   : > { %4297 = shalt.err (!%p4294_p11)
}
 0xc71   : > { %s4418_s30 = smov 512   ;;  %s4419_s0 = smov 32  }
 0xc72   : > { %3568 = dma.vmem_to_hbm [thread:$0]  (%p5465_p1), %s5319_s10, 2048, %s5317_s25, %s2966_s14, %s4418_s30, %s4418_s30, %s4419_s0  }
 0xc73 PF: > { %s5466_s29 = sld [smem:[#allocation17_spill]]  ;;  %s5467_s6 = sld [smem:[#allocation24_spill]] }
 0xc74   : > { %p3594_p4 = scmp.ge.s32.totalorder %s4404_s28, 2 }
 0xc79   : > { %s2995_s17 = sand.u32 1, %s5466_s29   ;;  %p5468_p13 = scmp.ne.s32.totalorder %s5467_s6, 0 }
 0xc7a   : > { %s2996_s18 = scalar_lea.sflag [#allocation4], %s2995_s17 }
 0xc7b   : > { %p3588_p0 = pnand %p3594_p4, %p5468_p13 }
 0xc7d   : > { %4359 = dma.done.wait (!%p3588_p0), %s2996_s18, 2048  }
 0xc7e   : > { %4361 = vsyncadd (!%p3588_p0), %s2996_s18, 4294965248  ;;  %s27_s28 = sadd.s32 1, %s4404_s28   ;;  %s5469_s7 = sld [smem:[#allocation18_spill]] }
 0xc7f   : > { %p24_p7 = scmp.ge.s32.totalorder %s27_s28, 6   ;;  %s5470_s23 = sld [smem:[#allocation27_spill]] }
 0xc80   : > { %s5471_s25 = sld [smem:[#allocation21_spill]]  ;;  %s5472_s10 = sld [smem:[#allocation25_spill]] }
 0xc81   : > { %s5473_s27 = sld [smem:[#allocation26_spill]]  ;;  %s5474_s18 = smov %s4368_s19 }
 0xc82   : > { %s5475_s19 = smov %s4372_s20  ;;  %s5476_s20 = smov %s4661_s16 }
 0xc83   : > { %s5477_s21 = smov %s4380_s22  ;;  %s5479_s24 = smov %s4396_s26 }
 0xc84   : > { %s5478_s22 = smov %s5469_s7  ;;  %26 = sbr.rel (!%p24_p7) target bundleno = 18 (0x12), region = 130 }
 0xc86   : > { %s5480_s26 = smov %s5472_s10 }
 0xc8b   :  { %3001 = vsyncpa [#allocation3], 1 }
 0xc8c   :  { %3003 = vsyncpa [#allocation3 + $0x1], 1 }
 0xc8d   :  { %3004 = vsyncpa [#allocation6], 1 }
 0xc8e   :  { %3006 = vsyncpa [#allocation6 + $0x1], 1 }
 0xc8f   :  { %3007 = vsyncpa [#allocation9], 1 }
 0xc90   :  { %3009 = vsyncpa [#allocation9 + $0x1], 1 }
 0xc91   :  { %3010 = vsyncpa [#allocation4], 1 }
 0xc92   :  { %3012 = vsyncpa [#allocation4 + $0x1], 1 }

</bundles_post_ra>
